<compile_context>
chip_gen: v5e
topology: v5e:2x2
jax: 0.10.0
libtpu: 0.0.40
codegen_flags: <defaults>
</compile_context>

<pallas_src>
import functools

import jax
import jax.numpy as jnp
from jax import lax
from jax.experimental import pallas as pl
from jax.experimental.pallas import tpu as pltpu

LANES = 128
_UNROLL_MAX_LAYERS = 8  # above this, use lax.fori_loop to bound live ranges / compile time


def _round_up(n: int, m: int) -> int:
    return ((n + m - 1) // m) * m


def _mlp_kernel(*refs, num_hidden_layers: int, out_chunks: int):
    """Fused MLP forward for one batch tile. All weights live fully in VMEM."""
    if num_hidden_layers > 0:
        x_ref, w1_ref, b1_ref, wh_ref, bh_ref, w2_ref, b2_ref, o_ref = refs
    else:
        x_ref, w1_ref, b1_ref, w2_ref, b2_ref, o_ref = refs
        wh_ref = bh_ref = None

    # lin1 + relu: MXU matmul (bf16 x bf16 -> f32 accumulate), bias/activation in f32.
    xv = x_ref[...].astype(w1_ref.dtype)
    h = jnp.dot(xv, w1_ref[...], preferred_element_type=jnp.float32)
    h = jnp.maximum(h + b1_ref[...], 0.0)

    # Hidden layers.
    if num_hidden_layers > 0:
        def layer(i, h):
            w_i = wh_ref[i]                                   # (Hp, Hp), compute dtype
            hn = jnp.dot(h.astype(w_i.dtype), w_i, preferred_element_type=jnp.float32)
            return jnp.maximum(hn + bh_ref[i], 0.0)           # bh_ref[i] is (1, Hp)

        if num_hidden_layers <= _UNROLL_MAX_LAYERS:
            for i in range(num_hidden_layers):
                h = layer(i, h)
        else:
            h = lax.fori_loop(0, num_hidden_layers, layer, h)

    # Final H -> 1 projection on the VPU (multiply) + XLU (lane reduction); MXU stays free.
    # b2 is a scalar read from SMEM.
    out = jnp.sum(h * w2_ref[...], axis=-1, keepdims=True) + b2_ref[0]   # (tile_b, 1) f32

    # Pack the per-row scalars lane-dense: each 128-row chunk becomes one row of 128 lanes
    # (multiply by identity + sublane reduce). Writeback is an unmasked, contiguous
    # (1, out_chunks, 128) block: ~4 B/row of HBM traffic instead of 512 B/row broadcast.
    ri = lax.broadcasted_iota(jnp.int32, (LANES, LANES), 0)
    ci = lax.broadcasted_iota(jnp.int32, (LANES, LANES), 1)
    eye = (ri == ci).astype(jnp.float32)
    for r in range(out_chunks):
        chunk = out[r * LANES:(r + 1) * LANES, :]                       # (128, 1)
        row = jnp.sum(chunk * eye, axis=0, keepdims=True)               # (1, 128) lane-dense
        o_ref[:, r:r + 1, :] = row[None].astype(o_ref.dtype)


def prepare_params(params, *, compute_dtype=jnp.bfloat16):
    """One-time pad (to 128-lane multiples) + cast of the weights.

    Hoisted out of the forward hot path so padding/cast HBM passes run once, not per call.
    """
    w1, b1, wh, bh, w2, b2 = (params["w1"], params["b1"], params["wh"],
                              params["bh"], params["w2"], params["b2"])
    D_in, H = w1.shape
    L = wh.shape[0]
    Dp = _round_up(D_in, LANES)
    Hp = _round_up(H, LANES)
    f32 = jnp.float32

    prepped = dict(
        input_dim=D_in, hidden_dim=H, layers=L, Dp=Dp, Hp=Hp, compute_dtype=compute_dtype,
        w1=jnp.zeros((Dp, Hp), compute_dtype).at[:D_in, :H].set(w1.astype(compute_dtype)),
        b1=jnp.zeros((1, Hp), f32).at[:, :H].set(b1.reshape(1, H).astype(f32)),
        w2=jnp.zeros((1, Hp), f32).at[:, :H].set(w2.reshape(H, 1).astype(f32).T),
        b2=b2.astype(f32).reshape(1),                                   # scalar via SMEM
    )
    if L > 0:
        prepped["wh"] = jnp.zeros((L, Hp, Hp), compute_dtype).at[:, :H, :H].set(
            wh.astype(compute_dtype))
        prepped["bh"] = jnp.zeros((L, 1, Hp), f32).at[:, 0, :H].set(bh.astype(f32))
    return prepped


def ff_net_forward(x, prepped, *, tile_b: int = 256):
    """x: [B, input_dim] float32. prepped: output of prepare_params. Returns [B, 1] f32."""
    B, D_in = x.shape
    assert D_in == prepped["input_dim"]
    Dp, Hp, L = prepped["Dp"], prepped["Hp"], prepped["layers"]
    compute_dtype = prepped["compute_dtype"]
    cdt = jnp.dtype(compute_dtype).itemsize

    # Batch tile: multiple of 128, no larger than the padded batch.
    tile_b = _round_up(max(LANES, min(tile_b, _round_up(B, LANES))), LANES)
    num_tiles = pl.cdiv(B, tile_b)
    Bp = num_tiles * tile_b
    chunks = tile_b // LANES

    # x: skip the wrapper pad/cast pass when shapes already line up (cast in-kernel);
    # otherwise pad + cast in a single fused pass.
    if D_in == Dp and B == Bp:
        x_in = x
    else:
        x_in = jnp.zeros((Bp, Dp), compute_dtype).at[:B, :D_in].set(x.astype(compute_dtype))
    x_cols = x_in.shape[1]
    x_itm = jnp.dtype(x_in.dtype).itemsize

    # VMEM budget: x/out tiles double-buffered, grid-invariant weights single-buffered.
    weight_bytes = Dp * Hp * cdt + Hp * 4 + Hp * 4
    if L > 0:
        weight_bytes += L * Hp * Hp * cdt + L * 8 * Hp * 4
    est = 2 * (tile_b * x_cols * x_itm + chunks * LANES * 4) + weight_bytes
    try:
        vmem_cap = int(pltpu.get_tpu_info().vmem_capacity_bytes)
    except Exception:
        vmem_cap = 64 * 1024 * 1024  # v7x per-TensorCore VMEM (smallest current generation)
    vmem_limit = int(min(max(est * 5 // 4, 16 * 1024 * 1024), int(0.85 * vmem_cap)))

    kernel = functools.partial(_mlp_kernel, num_hidden_layers=L, out_chunks=chunks)

    args = [x_in, prepped["w1"], prepped["b1"]]
    if L > 0:
        args += [prepped["wh"], prepped["bh"]]
    args += [prepped["w2"], prepped["b2"]]

    def build_specs(weight_buffering):
        wkw = {} if weight_buffering is None else {"pipeline_mode": weight_buffering}
        in_specs = [
            pl.BlockSpec((tile_b, x_cols), lambda i: (i, 0)),                 # x tile
            pl.BlockSpec((Dp, Hp), lambda i: (0, 0), **wkw),                  # w1 (resident)
            pl.BlockSpec((1, Hp), lambda i: (0, 0), **wkw),                   # b1
        ]
        if L > 0:
            in_specs += [
                pl.BlockSpec((L, Hp, Hp), lambda i: (0, 0, 0), **wkw),        # stacked hidden W
                pl.BlockSpec((L, 1, Hp), lambda i: (0, 0, 0), **wkw),         # stacked hidden b
            ]
        in_specs += [
            pl.BlockSpec((1, Hp), lambda i: (0, 0), **wkw),                   # w2 as a row
            pl.BlockSpec(memory_space=pltpu.MemorySpace.SMEM),                # b2 scalar
        ]
        return in_specs

    def run(weight_buffering):
        return pl.pallas_call(
            kernel,
            out_shape=jax.ShapeDtypeStruct((num_tiles, chunks, LANES), jnp.float32),
            grid=(num_tiles,),
            in_specs=build_specs(weight_buffering),
            out_specs=pl.BlockSpec((1, chunks, LANES), lambda i: (i, 0, 0)),
            compiler_params=pltpu.CompilerParams(
                dimension_semantics=("parallel",),
                vmem_limit_bytes=vmem_limit),
        )(*args)

    try:
        # Grid-invariant weights: single-buffered (no benefit from double buffering).
        out3 = run(pl.Buffered(1))
    except Exception:
        # Fallback for JAX builds that reject single-buffered pipeline_mode.
        out3 = run(None)

    # (num_tiles, chunks, 128) row-major == batch order; undo packing + batch padding.
    return out3.reshape(Bp, 1)[:B]


def init_params(key, input_dim, hidden_dim, layers):
    """Deterministic synthetic init. Weights already transposed to [in, out], float32."""
    ks = jax.random.split(key, 2 * (layers + 2))
    scale1 = 1.0 / jnp.sqrt(input_dim)
    scaleh = 1.0 / jnp.sqrt(hidden_dim)
    w1 = jax.random.uniform(ks[0], (input_dim, hidden_dim), jnp.float32, -scale1, scale1)
    b1 = jax.random.uniform(ks[1], (1, hidden_dim), jnp.float32, -scale1, scale1)
    wh = jnp.stack([
        jax.random.uniform(ks[2 + 2 * i], (hidden_dim, hidden_dim), jnp.float32, -scaleh, scaleh)
        for i in range(layers)
    ]) if layers > 0 else jnp.zeros((0, hidden_dim, hidden_dim), jnp.float32)
    bh = jnp.stack([
        jax.random.uniform(ks[3 + 2 * i], (hidden_dim,), jnp.float32, -scaleh, scaleh)
        for i in range(layers)
    ]) if layers > 0 else jnp.zeros((0, hidden_dim), jnp.float32)
    w2 = jax.random.uniform(ks[-2], (hidden_dim, 1), jnp.float32, -scaleh, scaleh)
    b2 = jax.random.uniform(ks[-1], (1, 1), jnp.float32, -scaleh, scaleh)
    return dict(w1=w1, b1=b1, wh=wh, bh=bh, w2=w2, b2=b2)


def ff_net_reference(x, params, compute_dtype=jnp.bfloat16):
    """Pure-JAX reference mirroring the kernel's dtype handling (bf16 matmul inputs, f32 math)."""
    f32 = jnp.float32
    cast = lambda a: a.astype(compute_dtype).astype(f32)
    h = jnp.maximum(cast(x) @ cast(params["w1"]) + params["b1"], 0.0)
    for i in range(params["wh"].shape[0]):
        h = jnp.maximum(cast(h) @ cast(params["wh"][i]) + params["bh"][i][None, :], 0.0)
    return h @ params["w2"] + params["b2"]


if __name__ == "__main__":
    # Small shapes consistent with the module's forward: x: [batch, input_dim].
    batch, input_dim, hidden_dim, layers = 256, 32, 64, 2

    key = jax.random.PRNGKey(0)
    kx, kp = jax.random.split(key)
    x = jax.random.normal(kx, (batch, input_dim), jnp.float32)
    params = init_params(kp, input_dim, hidden_dim, layers)
    prepped = prepare_params(params, compute_dtype=jnp.bfloat16)   # one-time weight prep

    out = ff_net_forward(x, prepped, tile_b=256)
    out = jax.block_until_ready(out)
    assert out.shape == (batch, 1)

    with jax.default_matmul_precision("float32"):
        ref = ff_net_reference(x, params, compute_dtype=jnp.bfloat16)
    assert jnp.allclose(out, ref, atol=1e-2, rtol=1e-2), "mismatch vs reference"

    print("KERNEL_OK")
</pallas_src>

<mosaic_0001>
module attributes {stable_mosaic.version = 11 : i64} {
  func.func @_mlp_kernel(%arg0: i32, %arg1: memref<256x128xbf16, #tpu.memory_space<vmem>>, %arg2: memref<128x128xbf16, #tpu.memory_space<vmem>>, %arg3: memref<1x128xf32, #tpu.memory_space<vmem>>, %arg4: memref<2x128x128xbf16, #tpu.memory_space<vmem>>, %arg5: memref<2x1x128xf32, #tpu.memory_space<vmem>>, %arg6: memref<1x128xf32, #tpu.memory_space<vmem>>, %arg7: memref<1xf32, #tpu.memory_space<smem>>, %arg8: memref<1x2x128xf32, #tpu.memory_space<vmem>>) attributes {dimension_semantics = [#tpu.dimension_semantics<parallel>], iteration_bounds = array<i64: 1>, scalar_prefetch = 0 : i64, scratch_operands = 0 : i64, tpu.core_type = #tpu.core_type<tc>, window_params = [{transform_indices = @transform_0, window_bounds = array<i64: 256, 128>}, {pipeline_mode = #tpu.pipeline_mode<synchronous>, transform_indices = @transform_1, window_bounds = array<i64: 128, 128>}, {pipeline_mode = #tpu.pipeline_mode<synchronous>, transform_indices = @transform_2, window_bounds = array<i64: 1, 128>}, {pipeline_mode = #tpu.pipeline_mode<synchronous>, transform_indices = @transform_3, window_bounds = array<i64: 2, 128, 128>}, {pipeline_mode = #tpu.pipeline_mode<synchronous>, transform_indices = @transform_4, window_bounds = array<i64: 2, 1, 128>}, {pipeline_mode = #tpu.pipeline_mode<synchronous>, transform_indices = @transform_5, window_bounds = array<i64: 1, 128>}, {transform_indices = @transform_6, window_bounds = array<i64: 1>}, {transform_indices = @transform_7, window_bounds = array<i64: 1, 2, 128>}]} {
    %c0 = arith.constant 0 : index
    %c0_0 = arith.constant 0 : index
    %0 = vector.load %arg1[%c0, %c0_0] : memref<256x128xbf16, #tpu.memory_space<vmem>>, vector<256x128xbf16>
    %c0_1 = arith.constant 0 : index
    %c0_2 = arith.constant 0 : index
    %1 = vector.load %arg2[%c0_1, %c0_2] : memref<128x128xbf16, #tpu.memory_space<vmem>>, vector<128x128xbf16>
    %cst = arith.constant dense<0.000000e+00> : vector<256x128xf32>
    %2 = tpu.matmul %0, %1, %cst {dimension_numbers = #tpu.dot_dimension_numbers<[1], [0], [0], [1], [0, 0, 1, 1], [], []>} : vector<256x128xbf16>, vector<128x128xbf16>, vector<256x128xf32> -> vector<256x128xf32>
    %c0_3 = arith.constant 0 : index
    %c0_4 = arith.constant 0 : index
    %3 = vector.load %arg3[%c0_3, %c0_4] : memref<1x128xf32, #tpu.memory_space<vmem>>, vector<1x128xf32>
    %4 = vector.broadcast %3 : vector<1x128xf32> to vector<256x128xf32>
    %5 = arith.addf %2, %4 : vector<256x128xf32>
    %cst_5 = arith.constant 0.000000e+00 : f32
    %6 = vector.broadcast %cst_5 : f32 to vector<256x128xf32>
    %7 = arith.maximumf %5, %6 : vector<256x128xf32>
    %c0_6 = arith.constant 0 : index
    %c0_7 = arith.constant 0 : index
    %c0_8 = arith.constant 0 : index
    %8 = vector.load %arg4[%c0_6, %c0_7, %c0_8] : memref<2x128x128xbf16, #tpu.memory_space<vmem>>, vector<1x128x128xbf16>
    %9 = vector.shape_cast %8 : vector<1x128x128xbf16> to vector<128x128xbf16>
    %10 = arith.truncf %7 : vector<256x128xf32> to vector<256x128xbf16>
    %cst_9 = arith.constant dense<0.000000e+00> : vector<256x128xf32>
    %11 = tpu.matmul %10, %9, %cst_9 {dimension_numbers = #tpu.dot_dimension_numbers<[1], [0], [0], [1], [0, 0, 1, 1], [], []>} : vector<256x128xbf16>, vector<128x128xbf16>, vector<256x128xf32> -> vector<256x128xf32>
    %c0_10 = arith.constant 0 : index
    %c0_11 = arith.constant 0 : index
    %c0_12 = arith.constant 0 : index
    %12 = vector.load %arg5[%c0_10, %c0_11, %c0_12] : memref<2x1x128xf32, #tpu.memory_space<vmem>>, vector<1x1x128xf32>
    %13 = vector.shape_cast %12 : vector<1x1x128xf32> to vector<1x128xf32>
    %14 = vector.broadcast %13 : vector<1x128xf32> to vector<256x128xf32>
    %15 = arith.addf %11, %14 : vector<256x128xf32>
    %cst_13 = arith.constant 0.000000e+00 : f32
    %16 = vector.broadcast %cst_13 : f32 to vector<256x128xf32>
    %17 = arith.maximumf %15, %16 : vector<256x128xf32>
    %c1 = arith.constant 1 : index
    %c0_14 = arith.constant 0 : index
    %c0_15 = arith.constant 0 : index
    %18 = vector.load %arg4[%c1, %c0_14, %c0_15] : memref<2x128x128xbf16, #tpu.memory_space<vmem>>, vector<1x128x128xbf16>
    %19 = vector.shape_cast %18 : vector<1x128x128xbf16> to vector<128x128xbf16>
    %20 = arith.truncf %17 : vector<256x128xf32> to vector<256x128xbf16>
    %cst_16 = arith.constant dense<0.000000e+00> : vector<256x128xf32>
    %21 = tpu.matmul %20, %19, %cst_16 {dimension_numbers = #tpu.dot_dimension_numbers<[1], [0], [0], [1], [0, 0, 1, 1], [], []>} : vector<256x128xbf16>, vector<128x128xbf16>, vector<256x128xf32> -> vector<256x128xf32>
    %c1_17 = arith.constant 1 : index
    %c0_18 = arith.constant 0 : index
    %c0_19 = arith.constant 0 : index
    %22 = vector.load %arg5[%c1_17, %c0_18, %c0_19] : memref<2x1x128xf32, #tpu.memory_space<vmem>>, vector<1x1x128xf32>
    %23 = vector.shape_cast %22 : vector<1x1x128xf32> to vector<1x128xf32>
    %24 = vector.broadcast %23 : vector<1x128xf32> to vector<256x128xf32>
    %25 = arith.addf %21, %24 : vector<256x128xf32>
    %cst_20 = arith.constant 0.000000e+00 : f32
    %26 = vector.broadcast %cst_20 : f32 to vector<256x128xf32>
    %27 = arith.maximumf %25, %26 : vector<256x128xf32>
    %c0_21 = arith.constant 0 : index
    %c0_22 = arith.constant 0 : index
    %28 = vector.load %arg6[%c0_21, %c0_22] : memref<1x128xf32, #tpu.memory_space<vmem>>, vector<1x128xf32>
    %29 = vector.broadcast %28 : vector<1x128xf32> to vector<256x128xf32>
    %30 = arith.mulf %27, %29 : vector<256x128xf32>
    %cst_23 = arith.constant dense<0.000000e+00> : vector<256xf32>
    %31 = vector.multi_reduction <add>, %30, %cst_23 [1] : vector<256x128xf32> to vector<256xf32>
    %32 = vector.shape_cast %31 : vector<256xf32> to vector<256x1xf32>
    %c0_24 = arith.constant 0 : index
    %33 = memref.load %arg7[%c0_24] : memref<1xf32, #tpu.memory_space<smem>>
    %34 = vector.broadcast %33 : f32 to vector<256x1xf32>
    %35 = arith.addf %32, %34 : vector<256x1xf32>
    %36 = tpu.iota {dimensions = array<i32: 0>} : vector<128x128xi32>
    %37 = tpu.iota {dimensions = array<i32: 1>} : vector<128x128xi32>
    %38 = arith.cmpi eq, %36, %37 : vector<128x128xi32>
    %39 = arith.extui %38 : vector<128x128xi1> to vector<128x128xi32>
    %40 = arith.sitofp %39 : vector<128x128xi32> to vector<128x128xf32>
    %41 = vector.extract_strided_slice %35 {offsets = [0, 0], sizes = [128, 1], strides = [1, 1]} : vector<256x1xf32> to vector<128x1xf32>
    %42 = vector.broadcast %41 : vector<128x1xf32> to vector<128x128xf32>
    %43 = arith.mulf %42, %40 : vector<128x128xf32>
    %cst_25 = arith.constant dense<0.000000e+00> : vector<128xf32>
    %44 = vector.multi_reduction <add>, %43, %cst_25 [0] : vector<128x128xf32> to vector<128xf32>
    %45 = vector.shape_cast %44 : vector<128xf32> to vector<1x128xf32>
    %46 = vector.shape_cast %45 : vector<1x128xf32> to vector<1x1x128xf32>
    %c0_26 = arith.constant 0 : index
    %c0_27 = arith.constant 0 : index
    %c0_28 = arith.constant 0 : index
    %47 = vector.load %arg8[%c0_26, %c0_27, %c0_28] : memref<1x2x128xf32, #tpu.memory_space<vmem>>, vector<1x1x128xf32>
    tpu.vector_store %arg8[%c0_26, %c0_27, %c0_28], %46 {strides = array<i32>} : memref<1x2x128xf32, #tpu.memory_space<vmem>>, vector<1x1x128xf32>,
    %48 = vector.extract_strided_slice %35 {offsets = [128, 0], sizes = [128, 1], strides = [1, 1]} : vector<256x1xf32> to vector<128x1xf32>
    %49 = vector.broadcast %48 : vector<128x1xf32> to vector<128x128xf32>
    %50 = arith.mulf %49, %40 : vector<128x128xf32>
    %cst_29 = arith.constant dense<0.000000e+00> : vector<128xf32>
    %51 = vector.multi_reduction <add>, %50, %cst_29 [0] : vector<128x128xf32> to vector<128xf32>
    %52 = vector.shape_cast %51 : vector<128xf32> to vector<1x128xf32>
    %53 = vector.shape_cast %52 : vector<1x128xf32> to vector<1x1x128xf32>
    %c0_30 = arith.constant 0 : index
    %c1_31 = arith.constant 1 : index
    %c0_32 = arith.constant 0 : index
    %54 = vector.load %arg8[%c0_30, %c1_31, %c0_32] : memref<1x2x128xf32, #tpu.memory_space<vmem>>, vector<1x1x128xf32>
    tpu.vector_store %arg8[%c0_30, %c1_31, %c0_32], %53 {strides = array<i32>} : memref<1x2x128xf32, #tpu.memory_space<vmem>>, vector<1x1x128xf32>,
    return
  }
  func.func @transform_0(%arg0: i32) -> (i32, i32) {
    %c0_i32 = arith.constant 0 : i32
    %c0_i32_0 = arith.constant 0 : i32
    return %arg0, %c0_i32 : i32, i32
  }
  func.func @transform_1(%arg0: i32) -> (i32, i32) {
    %c0_i32 = arith.constant 0 : i32
    %c0_i32_0 = arith.constant 0 : i32
    %c0_i32_1 = arith.constant 0 : i32
    return %c0_i32, %c0_i32_0 : i32, i32
  }
  func.func @transform_2(%arg0: i32) -> (i32, i32) {
    %c0_i32 = arith.constant 0 : i32
    %c0_i32_0 = arith.constant 0 : i32
    %c0_i32_1 = arith.constant 0 : i32
    return %c0_i32, %c0_i32_0 : i32, i32
  }
  func.func @transform_3(%arg0: i32) -> (i32, i32, i32) {
    %c0_i32 = arith.constant 0 : i32
    %c0_i32_0 = arith.constant 0 : i32
    %c0_i32_1 = arith.constant 0 : i32
    %c0_i32_2 = arith.constant 0 : i32
    return %c0_i32, %c0_i32_0, %c0_i32_1 : i32, i32, i32
  }
  func.func @transform_4(%arg0: i32) -> (i32, i32, i32) {
    %c0_i32 = arith.constant 0 : i32
    %c0_i32_0 = arith.constant 0 : i32
    %c0_i32_1 = arith.constant 0 : i32
    %c0_i32_2 = arith.constant 0 : i32
    return %c0_i32, %c0_i32_0, %c0_i32_1 : i32, i32, i32
  }
  func.func @transform_5(%arg0: i32) -> (i32, i32) {
    %c0_i32 = arith.constant 0 : i32
    %c0_i32_0 = arith.constant 0 : i32
    %c0_i32_1 = arith.constant 0 : i32
    return %c0_i32, %c0_i32_0 : i32, i32
  }
  func.func @transform_6(%arg0: i32) -> i32 {
    %c0_i32 = arith.constant 0 : i32
    %c0_i32_0 = arith.constant 0 : i32
    return %c0_i32 : i32
  }
  func.func @transform_7(%arg0: i32) -> (i32, i32, i32) {
    %c0_i32 = arith.constant 0 : i32
    %c0_i32_0 = arith.constant 0 : i32
    %c0_i32_1 = arith.constant 0 : i32
    return %arg0, %c0_i32, %c0_i32_0 : i32, i32, i32
  }
}

module attributes {stable_mosaic.version = 11 : i64} {
  func.func @_mlp_kernel(%arg0: i32, %arg1: memref<256x128xbf16, #tpu.memory_space<vmem>>, %arg2: memref<128x128xbf16, #tpu.memory_space<vmem>>, %arg3: memref<1x128xf32, #tpu.memory_space<vmem>>, %arg4: memref<2x128x128xbf16, #tpu.memory_space<vmem>>, %arg5: memref<2x1x128xf32, #tpu.memory_space<vmem>>, %arg6: memref<1x128xf32, #tpu.memory_space<vmem>>, %arg7: memref<1xf32, #tpu.memory_space<smem>>, %arg8: memref<1x2x128xf32, #tpu.memory_space<vmem>>) attributes {dimension_semantics = [#tpu.dimension_semantics<parallel>], iteration_bounds = array<i64: 1>, scalar_prefetch = 0 : i64, scratch_operands = 0 : i64, tpu.core_type = #tpu.core_type<tc>, window_params = [{transform_indices = @transform_0, window_bounds = array<i64: 256, 128>}, {pipeline_mode = #tpu.pipeline_mode<synchronous>, transform_indices = @transform_1, window_bounds = array<i64: 128, 128>}, {pipeline_mode = #tpu.pipeline_mode<synchronous>, transform_indices = @transform_2, window_bounds = array<i64: 1, 128>}, {pipeline_mode = #tpu.pipeline_mode<synchronous>, transform_indices = @transform_3, window_bounds = array<i64: 2, 128, 128>}, {pipeline_mode = #tpu.pipeline_mode<synchronous>, transform_indices = @transform_4, window_bounds = array<i64: 2, 1, 128>}, {pipeline_mode = #tpu.pipeline_mode<synchronous>, transform_indices = @transform_5, window_bounds = array<i64: 1, 128>}, {transform_indices = @transform_6, window_bounds = array<i64: 1>}, {transform_indices = @transform_7, window_bounds = array<i64: 1, 2, 128>}]} {
    %c0 = arith.constant 0 : index
    %c0_0 = arith.constant 0 : index
    %0 = vector.load %arg1[%c0, %c0_0] : memref<256x128xbf16, #tpu.memory_space<vmem>>, vector<256x128xbf16>
    %c0_1 = arith.constant 0 : index
    %c0_2 = arith.constant 0 : index
    %1 = vector.load %arg2[%c0_1, %c0_2] : memref<128x128xbf16, #tpu.memory_space<vmem>>, vector<128x128xbf16>
    %cst = arith.constant dense<0.000000e+00> : vector<256x128xf32>
    %2 = tpu.matmul %0, %1, %cst {dimension_numbers = #tpu.dot_dimension_numbers<[1], [0], [0], [1], [0, 0, 1, 1], [], []>} : vector<256x128xbf16>, vector<128x128xbf16>, vector<256x128xf32> -> vector<256x128xf32>
    %c0_3 = arith.constant 0 : index
    %c0_4 = arith.constant 0 : index
    %3 = vector.load %arg3[%c0_3, %c0_4] : memref<1x128xf32, #tpu.memory_space<vmem>>, vector<1x128xf32>
    %4 = vector.broadcast %3 : vector<1x128xf32> to vector<256x128xf32>
    %5 = arith.addf %2, %4 : vector<256x128xf32>
    %cst_5 = arith.constant 0.000000e+00 : f32
    %6 = vector.broadcast %cst_5 : f32 to vector<256x128xf32>
    %7 = arith.maximumf %5, %6 : vector<256x128xf32>
    %c0_6 = arith.constant 0 : index
    %c0_7 = arith.constant 0 : index
    %c0_8 = arith.constant 0 : index
    %8 = vector.load %arg4[%c0_6, %c0_7, %c0_8] : memref<2x128x128xbf16, #tpu.memory_space<vmem>>, vector<1x128x128xbf16>
    %9 = vector.shape_cast %8 : vector<1x128x128xbf16> to vector<128x128xbf16>
    %10 = arith.truncf %7 : vector<256x128xf32> to vector<256x128xbf16>
    %cst_9 = arith.constant dense<0.000000e+00> : vector<256x128xf32>
    %11 = tpu.matmul %10, %9, %cst_9 {dimension_numbers = #tpu.dot_dimension_numbers<[1], [0], [0], [1], [0, 0, 1, 1], [], []>} : vector<256x128xbf16>, vector<128x128xbf16>, vector<256x128xf32> -> vector<256x128xf32>
    %c0_10 = arith.constant 0 : index
    %c0_11 = arith.constant 0 : index
    %c0_12 = arith.constant 0 : index
    %12 = vector.load %arg5[%c0_10, %c0_11, %c0_12] : memref<2x1x128xf32, #tpu.memory_space<vmem>>, vector<1x1x128xf32>
    %13 = vector.shape_cast %12 : vector<1x1x128xf32> to vector<1x128xf32>
    %14 = vector.broadcast %13 : vector<1x128xf32> to vector<256x128xf32>
    %15 = arith.addf %11, %14 : vector<256x128xf32>
    %cst_13 = arith.constant 0.000000e+00 : f32
    %16 = vector.broadcast %cst_13 : f32 to vector<256x128xf32>
    %17 = arith.maximumf %15, %16 : vector<256x128xf32>
    %c1 = arith.constant 1 : index
    %c0_14 = arith.constant 0 : index
    %c0_15 = arith.constant 0 : index
    %18 = vector.load %arg4[%c1, %c0_14, %c0_15] : memref<2x128x128xbf16, #tpu.memory_space<vmem>>, vector<1x128x128xbf16>
    %19 = vector.shape_cast %18 : vector<1x128x128xbf16> to vector<128x128xbf16>
    %20 = arith.truncf %17 : vector<256x128xf32> to vector<256x128xbf16>
    %cst_16 = arith.constant dense<0.000000e+00> : vector<256x128xf32>
    %21 = tpu.matmul %20, %19, %cst_16 {dimension_numbers = #tpu.dot_dimension_numbers<[1], [0], [0], [1], [0, 0, 1, 1], [], []>} : vector<256x128xbf16>, vector<128x128xbf16>, vector<256x128xf32> -> vector<256x128xf32>
    %c1_17 = arith.constant 1 : index
    %c0_18 = arith.constant 0 : index
    %c0_19 = arith.constant 0 : index
    %22 = vector.load %arg5[%c1_17, %c0_18, %c0_19] : memref<2x1x128xf32, #tpu.memory_space<vmem>>, vector<1x1x128xf32>
    %23 = vector.shape_cast %22 : vector<1x1x128xf32> to vector<1x128xf32>
    %24 = vector.broadcast %23 : vector<1x128xf32> to vector<256x128xf32>
    %25 = arith.addf %21, %24 : vector<256x128xf32>
    %cst_20 = arith.constant 0.000000e+00 : f32
    %26 = vector.broadcast %cst_20 : f32 to vector<256x128xf32>
    %27 = arith.maximumf %25, %26 : vector<256x128xf32>
    %c0_21 = arith.constant 0 : index
    %c0_22 = arith.constant 0 : index
    %28 = vector.load %arg6[%c0_21, %c0_22] : memref<1x128xf32, #tpu.memory_space<vmem>>, vector<1x128xf32>
    %29 = vector.broadcast %28 : vector<1x128xf32> to vector<256x128xf32>
    %30 = arith.mulf %27, %29 : vector<256x128xf32>
    %cst_23 = arith.constant dense<0.000000e+00> : vector<256xf32>
    %31 = vector.multi_reduction <add>, %30, %cst_23 [1] : vector<256x128xf32> to vector<256xf32>
    %32 = vector.shape_cast %31 : vector<256xf32> to vector<256x1xf32>
    %c0_24 = arith.constant 0 : index
    %33 = memref.load %arg7[%c0_24] : memref<1xf32, #tpu.memory_space<smem>>
    %34 = vector.broadcast %33 : f32 to vector<256x1xf32>
    %35 = arith.addf %32, %34 : vector<256x1xf32>
    %36 = tpu.iota {dimensions = array<i32: 0>} : vector<128x128xi32>
    %37 = tpu.iota {dimensions = array<i32: 1>} : vector<128x128xi32>
    %38 = arith.cmpi eq, %36, %37 : vector<128x128xi32>
    %39 = arith.extui %38 : vector<128x128xi1> to vector<128x128xi32>
    %40 = arith.sitofp %39 : vector<128x128xi32> to vector<128x128xf32>
    %41 = vector.extract_strided_slice %35 {offsets = [0, 0], sizes = [128, 1], strides = [1, 1]} : vector<256x1xf32> to vector<128x1xf32>
    %42 = vector.broadcast %41 : vector<128x1xf32> to vector<128x128xf32>
    %43 = arith.mulf %42, %40 : vector<128x128xf32>
    %cst_25 = arith.constant dense<0.000000e+00> : vector<128xf32>
    %44 = vector.multi_reduction <add>, %43, %cst_25 [0] : vector<128x128xf32> to vector<128xf32>
    %45 = vector.shape_cast %44 : vector<128xf32> to vector<1x128xf32>
    %46 = vector.shape_cast %45 : vector<1x128xf32> to vector<1x1x128xf32>
    %c0_26 = arith.constant 0 : index
    %c0_27 = arith.constant 0 : index
    %c0_28 = arith.constant 0 : index
    %47 = vector.load %arg8[%c0_26, %c0_27, %c0_28] : memref<1x2x128xf32, #tpu.memory_space<vmem>>, vector<1x1x128xf32>
    tpu.vector_store %arg8[%c0_26, %c0_27, %c0_28], %46 {strides = array<i32>} : memref<1x2x128xf32, #tpu.memory_space<vmem>>, vector<1x1x128xf32>,
    %48 = vector.extract_strided_slice %35 {offsets = [128, 0], sizes = [128, 1], strides = [1, 1]} : vector<256x1xf32> to vector<128x1xf32>
    %49 = vector.broadcast %48 : vector<128x1xf32> to vector<128x128xf32>
    %50 = arith.mulf %49, %40 : vector<128x128xf32>
    %cst_29 = arith.constant dense<0.000000e+00> : vector<128xf32>
    %51 = vector.multi_reduction <add>, %50, %cst_29 [0] : vector<128x128xf32> to vector<128xf32>
    %52 = vector.shape_cast %51 : vector<128xf32> to vector<1x128xf32>
    %53 = vector.shape_cast %52 : vector<1x128xf32> to vector<1x1x128xf32>
    %c0_30 = arith.constant 0 : index
    %c1_31 = arith.constant 1 : index
    %c0_32 = arith.constant 0 : index
    %54 = vector.load %arg8[%c0_30, %c1_31, %c0_32] : memref<1x2x128xf32, #tpu.memory_space<vmem>>, vector<1x1x128xf32>
    tpu.vector_store %arg8[%c0_30, %c1_31, %c0_32], %53 {strides = array<i32>} : memref<1x2x128xf32, #tpu.memory_space<vmem>>, vector<1x1x128xf32>,
    return
  }
  func.func @transform_0(%arg0: i32) -> (i32, i32) {
    %c0_i32 = arith.constant 0 : i32
    %c0_i32_0 = arith.constant 0 : i32
    return %arg0, %c0_i32 : i32, i32
  }
  func.func @transform_1(%arg0: i32) -> (i32, i32) {
    %c0_i32 = arith.constant 0 : i32
    %c0_i32_0 = arith.constant 0 : i32
    %c0_i32_1 = arith.constant 0 : i32
    return %c0_i32, %c0_i32_0 : i32, i32
  }
  func.func @transform_2(%arg0: i32) -> (i32, i32) {
    %c0_i32 = arith.constant 0 : i32
    %c0_i32_0 = arith.constant 0 : i32
    %c0_i32_1 = arith.constant 0 : i32
    return %c0_i32, %c0_i32_0 : i32, i32
  }
  func.func @transform_3(%arg0: i32) -> (i32, i32, i32) {
    %c0_i32 = arith.constant 0 : i32
    %c0_i32_0 = arith.constant 0 : i32
    %c0_i32_1 = arith.constant 0 : i32
    %c0_i32_2 = arith.constant 0 : i32
    return %c0_i32, %c0_i32_0, %c0_i32_1 : i32, i32, i32
  }
  func.func @transform_4(%arg0: i32) -> (i32, i32, i32) {
    %c0_i32 = arith.constant 0 : i32
    %c0_i32_0 = arith.constant 0 : i32
    %c0_i32_1 = arith.constant 0 : i32
    %c0_i32_2 = arith.constant 0 : i32
    return %c0_i32, %c0_i32_0, %c0_i32_1 : i32, i32, i32
  }
  func.func @transform_5(%arg0: i32) -> (i32, i32) {
    %c0_i32 = arith.constant 0 : i32
    %c0_i32_0 = arith.constant 0 : i32
    %c0_i32_1 = arith.constant 0 : i32
    return %c0_i32, %c0_i32_0 : i32, i32
  }
  func.func @transform_6(%arg0: i32) -> i32 {
    %c0_i32 = arith.constant 0 : i32
    %c0_i32_0 = arith.constant 0 : i32
    return %c0_i32 : i32
  }
  func.func @transform_7(%arg0: i32) -> (i32, i32, i32) {
    %c0_i32 = arith.constant 0 : i32
    %c0_i32_0 = arith.constant 0 : i32
    %c0_i32_1 = arith.constant 0 : i32
    return %arg0, %c0_i32, %c0_i32_0 : i32, i32, i32
  }
}

</mosaic_0001>

<bundles_post_ra>
// kernel: tpu_custom_call.1
= control target key start
LH: loop header
LB: loop body
LE: loop exit
PB: predicated region body
PF: predicated region fallthrough
CT: control target
= control target key end

     0   :  { %13 = vsyncpa [#allocation4], 0  ;;  %s1788_s0 = inlined_call_operand.hbm [shape: bf16[256,128], index: 0, kind: input, shape index: {}]   ;;  %s1789_s1 = inlined_call_operand.hbm [shape: bf16[128,128], index: 1, kind: input, shape index: {}]   ;;  %s1790_s2 = inlined_call_operand.vmem [shape: f32[1,128], index: 2, kind: input, shape index: {}]   ;;  %s1791_s3 = inlined_call_operand.hbm [shape: bf16[2,128,128], index: 3, kind: input, shape index: {}]   ;;  %s1792_s4 = inlined_call_operand.vmem [shape: f32[2,1,128], index: 4, kind: input, shape index: {}]   ;;  %s1793_s5 = inlined_call_operand.vmem [shape: f32[1,128], index: 5, kind: input, shape index: {}]   ;;  %s1794_s6 = inlined_call_operand.<no memory space> [shape: f32[1], index: 6, kind: input, shape index: {}]   ;;  %s1795_s7 = inlined_call_operand.hbm [shape: f32[1,2,128], index: 7, kind: output, shape index: {}]  }
   0x1   :  { %14 = vsyncpa [#allocation7], 0 }
   0x2   :  { %15 = vsyncpa [#allocation5], 0  ;;  %s33_s26 = sshll.u32 %s1789_s1, 4  ;;  %s1453_s27 = smov [#allocation6]   ;;  %s34_s26 = int_to_ptr.hbm [resolvable:$true] %s33_s26 }
   0x3   :  { %s35_s28 = sshll.u32 %s1453_s27, 4  ;;  %s20_s8 = sshll.u32 %s1788_s0, 4  ;;  %s36_s28 = int_to_ptr.vmem [resolvable:$true] %s35_s28  ;;  %s21_s8 = int_to_ptr.hbm [resolvable:$true] %s20_s8 }
   0x4   :  { %s1454_s9 = smov 64   ;;  %s1455_s10 = smov 4  }
   0x5   :  { %41 = dma.hbm_to_vmem [thread:$0]  %s34_s26, 1024, %s36_s28, [#allocation7], %s1454_s9, %s1454_s9, %s1455_s10  }
   0x6   :  { %s1456_s11 = smov [#allocation3]   ;;  %s48_s15 = sshll.u32 %s1791_s3, 4  ;;  %s49_s15 = int_to_ptr.hbm [resolvable:$true] %s48_s15 }
   0x7   :  { %s22_s12 = sshll.u32 %s1456_s11, 4  ;;  %s1457_s1 = smov [#allocation8]   ;;  %s23_s12 = int_to_ptr.vmem [resolvable:$true] %s22_s12 }
   0x8   :  { %28 = dma.hbm_to_vmem [thread:$0]  %s21_s8, 2048, %s23_s12, [#allocation4], %s1454_s9, %s1454_s9, %s1455_s10  }
   0x9   :  { %s50_s16 = sshll.u32 %s1457_s1, 4  ;;  %s51_s16 = int_to_ptr.vmem [resolvable:$true] %s50_s16 }
   0xa   :  { %56 = dma.hbm_to_vmem [thread:$0]  %s49_s15, 2048, %s51_s16, [#allocation7], %s1454_s9, %s1454_s9, %s1455_s10  }
   0xb   :  { %1447 = dma.done.wait [#allocation4], 2048  }
   0xc   :  { %1448 = vsyncadd [#allocation4], 4294965248 }
   0xd   :  { %1449 = dma.done.wait [#allocation7], 3072  }
   0xe   :  { %1450 = vsyncadd [#allocation7], 4294964224  ;;  %v1299_v0 = vld [vmem:[#allocation6 + $0x38] sm:$0xff]  ;;  %v1298_v1 = vld [vmem:[#allocation6 + $0x30] sm:$0xff]  ;;  %s1088_s25 = sshll.u32 %s1795_s7, 4  ;;  %s1089_s25 = int_to_ptr.hbm [resolvable:$true] %s1088_s25 }
   0xf   :  { %271 = vmatpush.bf16.msra.mxu0 %v1299_v0  ;;  %1316 = vmatpush.bf16.msra.mxu3 %v1299_v0  ;;  %v1297_v2 = vld [vmem:[#allocation6 + $0x28] sm:$0xff]  ;;  %v1296_v3 = vld [vmem:[#allocation6 + $0x20] sm:$0xff]  ;;  %v1295_v4 = vld [vmem:[#allocation6 + $0x18] sm:$0xff] }
  0x10   :  { %v1294_v5 = vld [vmem:[#allocation6 + $0x10] sm:$0xff]  ;;  %v1293_v6 = vld [vmem:[#allocation6 + $0x8] sm:$0xff]  ;;  %v1292_v7 = vld [vmem:[#allocation6] sm:$0xff] }
  0x11   :  { %v1276_v8 = vld [vmem:[#allocation3] sm:$0xff]  ;;  %v1277_v10 = vld [vmem:[#allocation3 + $0x8] sm:$0xff]  ;;  %v1278_v12 = vld [vmem:[#allocation3 + $0x10] sm:$0xff] }
  0x12   :  { %v1288_v9 = vld [vmem:[#allocation3 + $0x60] sm:$0xff]  ;;  %v1289_v11 = vld [vmem:[#allocation3 + $0x68] sm:$0xff]  ;;  %v1279_v13 = vld [vmem:[#allocation3 + $0x18] sm:$0xff] }
  0x13   :  { %272 = vmatpush.bf16.msra.mxu0 %v1298_v1  ;;  %1317 = vmatpush.bf16.msra.mxu3 %v1298_v1  ;;  %v1280_v14 = vld [vmem:[#allocation3 + $0x20] sm:$0xff]  ;;  %v1307_v15 = vld [vmem:[#allocation8 + $0x38] sm:$0xff]  ;;  %v1281_v16 = vld [vmem:[#allocation3 + $0x28] sm:$0xff] }
  0x14   :  { %476 = vmatpush.bf16.msra.mxu1 %v1307_v15  ;;  %v1306_v17 = vld [vmem:[#allocation8 + $0x30] sm:$0xff]  ;;  %v1305_v18 = vld [vmem:[#allocation8 + $0x28] sm:$0xff]  ;;  %v1304_v19 = vld [vmem:[#allocation8 + $0x20] sm:$0xff] }
  0x15   :  { %v1303_v20 = vld [vmem:[#allocation8 + $0x18] sm:$0xff]  ;;  %v1282_v21 = vld [vmem:[#allocation3 + $0x30] sm:$0xff]  ;;  %v1301_v24 = vld [vmem:[#allocation8 + $0x8] sm:$0xff] }
  0x16   :  { %v1290_v22 = vld [vmem:[#allocation3 + $0x70] sm:$0xff]  ;;  %v1300_v25 = vld [vmem:[#allocation8] sm:$0xff]  ;;  %v1283_v26 = vld [vmem:[#allocation3 + $0x38] sm:$0xff] }
  0x17   :  { %273 = vmatpush.bf16.msra.mxu0 %v1297_v2  ;;  %1318 = vmatpush.bf16.msra.mxu3 %v1297_v2  ;;  %v1302_v23 = vld [vmem:[#allocation8 + $0x10] sm:$0xff]  ;;  %v1291_v27 = vld [vmem:[#allocation3 + $0x78] sm:$0xff]  ;;  %v1284_v28 = vld [vmem:[#allocation3 + $0x40] sm:$0xff] }
  0x18   :  { %477 = vmatpush.bf16.msra.mxu1 %v1306_v17  ;;  %v1512_v30 = vld [vmem:[%s1790_s2] ss:$0 sm:$0xff]  ;;  %v1285_v41 = vld [vmem:[#allocation3 + $0x48] sm:$0xff]  ;;  %v1286_v56 = vld [vmem:[#allocation3 + $0x50] sm:$0xff] }
  0x1b   :  { %274 = vmatpush.bf16.msra.mxu0 %v1296_v3  ;;  %1319 = vmatpush.bf16.msra.mxu3 %v1296_v3  ;;  %v1287_v3 = vld [vmem:[#allocation3 + $0x58] sm:$0xff] }
  0x1c   :  { %478 = vmatpush.bf16.msra.mxu1 %v1305_v18 }
  0x1f   :  { %275 = vmatpush.bf16.msra.mxu0 %v1295_v4  ;;  %1320 = vmatpush.bf16.msra.mxu3 %v1295_v4 }
  0x20   :  { %479 = vmatpush.bf16.msra.mxu1 %v1304_v19 }
  0x23   :  { %276 = vmatpush.bf16.msra.mxu0 %v1294_v5  ;;  %1321 = vmatpush.bf16.msra.mxu3 %v1294_v5 }
  0x24   :  { %480 = vmatpush.bf16.msra.mxu1 %v1303_v20 }
  0x27   :  { %277 = vmatpush.bf16.msra.mxu0 %v1293_v6  ;;  %1322 = vmatpush.bf16.msra.mxu3 %v1293_v6 }
  0x28   :  { %481 = vmatpush.bf16.msra.mxu1 %v1302_v23 }
  0x2b   :  { %278 = vmatpush.bf16.msra.mxu0 %v1292_v7  ;;  %1323 = vmatpush.bf16.msra.mxu3 %v1292_v7 }
  0x2c   :  { %482 = vmatpush.bf16.msra.mxu1 %v1301_v24 }
  0x2e   :  { %279 = vmatmul.bf16.vlgmr.msra.gmra.mxu0 %v1276_v8  ;;  %339 = vmatmul.bf16.vlgmr.msra.gmra.mxu3 %v1288_v9 }
  0x2f   :  { %1324 = vmatpush.bf16.msrb.mxu3 %v1307_v15 }
  0x30   :  { %483 = vmatpush.bf16.msra.mxu1 %v1300_v25 }
  0x33   :  { %1325 = vmatpush.bf16.msrb.mxu3 %v1306_v17 }
  0x37   :  { %1326 = vmatpush.bf16.msrb.mxu3 %v1305_v18 }
  0x3b   :  { %1327 = vmatpush.bf16.msrb.mxu3 %v1304_v19 }
  0x3e   :  { %284 = vmatmul.bf16.gmra.mxu0 %v1277_v10  ;;  %344 = vmatmul.bf16.gmra.mxu3 %v1289_v11 }
  0x3f   :  { %1328 = vmatpush.bf16.msrb.mxu3 %v1303_v20 }
  0x43   :  { %1329 = vmatpush.bf16.msrb.mxu3 %v1302_v23 }
  0x47   :  { %1330 = vmatpush.bf16.msrb.mxu3 %v1301_v24 }
  0x4b   :  { %1331 = vmatpush.bf16.msrb.mxu3 %v1300_v25 }
  0x4e   :  { %289 = vmatmul.bf16.gmra.mxu0 %v1278_v12  ;;  %349 = vmatmul.bf16.gmra.mxu3 %v1290_v22  ;;  %v1315_v22 = vld [vmem:[#allocation8 + $0x78] sm:$0xff] }
  0x4f   :  { %683 = vmatpush.bf16.msra.mxu2 %v1315_v22  ;;  %1332 = vmatpush.bf16.msra.mxu3 %v1315_v22 }
  0x5e   :  { %294 = vmatmul.bf16.gmra.mxu0 %v1279_v13  ;;  %354 = vmatmul.bf16.gmra.mxu3 %v1291_v27 }
  0x6e   :  { %299 = vmatmul.bf16.gmra.mxu0 %v1280_v14 }
  0x7e   :  { %304 = vmatmul.bf16.gmra.mxu0 %v1281_v16 }
  0x8e   :  { %309 = vmatmul.bf16.gmra.mxu0 %v1282_v21 }
  0x9e   :  { %314 = vmatmul.bf16.gmra.mxu0 %v1283_v26  ;;  %v1314_v26 = vld [vmem:[#allocation8 + $0x70] sm:$0xff] }
  0x9f   :  { %684 = vmatpush.bf16.msra.mxu2 %v1314_v26  ;;  %1333 = vmatpush.bf16.msra.mxu3 %v1314_v26 }
  0xab   :  { %v280_v29 = vpop.f32.mrf.mxu0 }
  0xac   :  { %v281_v32 = vadd.f32 %v1512_v30, %v280_v29 }
  0xae   :  { %319 = vmatmul.bf16.gmra.mxu0 %v1284_v28  ;;  %v360_v35 = vmax.f32 %v281_v32, 0.0  ;;  %v1313_v28 = vld [vmem:[#allocation8 + $0x68] sm:$0xff] }
  0xaf   :  { %685 = vmatpush.bf16.msra.mxu2 %v1313_v28  ;;  %1334 = vmatpush.bf16.msra.mxu3 %v1313_v28 }
  0xb1   :  { %v340_v31 = vpop.f32.mrf.mxu3 }
  0xb2   :  { %v341_v37 = vadd.f32 %v1512_v30, %v340_v31  ;;  %v1312_v31 = vld [vmem:[#allocation8 + $0x60] sm:$0xff] }
  0xb3   :  { %v282_v33 = vpop.f32.mrf.mxu0  ;;  %686 = vmatpush.bf16.msra.mxu2 %v1312_v31  ;;  %1335 = vmatpush.bf16.msra.mxu3 %v1312_v31 }
  0xb4   :  { %v283_v34 = vadd.f32 %v1512_v30, %v282_v33  ;;  %v384_v40 = vmax.f32 %v341_v37, 0.0 }
  0xb6   :  { %v361_v36 = vmax.f32 %v283_v34, 0.0 }
  0xb8   :  { %v408_v38 = vpack.c.bf16 %v361_v36, %v360_v35  ;;  %v1311_v36 = vld [vmem:[#allocation8 + $0x58] sm:$0xff] }
  0xb9   :  { %v342_v39 = vpop.f32.mrf.mxu3  ;;  %687 = vmatpush.bf16.msra.mxu2 %v1311_v36  ;;  %1336 = vmatpush.bf16.msra.mxu3 %v1311_v36 }
  0xba   :  { %484 = vmatmul.bf16.vlgmr.msra.gmra.mxu1 %v408_v38  ;;  %v343_v42 = vadd.f32 %v1512_v30, %v342_v39 }
  0xbb   :  { %v285_v43 = vpop.f32.mrf.mxu0 }
  0xbc   :  { %v385_v44 = vmax.f32 %v343_v42, 0.0  ;;  %v286_v47 = vadd.f32 %v1512_v30, %v285_v43  ;;  %v1310_v43 = vld [vmem:[#allocation8 + $0x50] sm:$0xff] }
  0xbd   :  { %688 = vmatpush.bf16.msra.mxu2 %v1310_v43  ;;  %1337 = vmatpush.bf16.msra.mxu3 %v1310_v43 }
  0xbe   :  { %324 = vmatmul.bf16.gmra.mxu0 %v1285_v41  ;;  %v420_v45 = vpack.c.bf16 %v385_v44, %v384_v40  ;;  %v362_v50 = vmax.f32 %v286_v47, 0.0  ;;  %v1309_v47 = vld [vmem:[#allocation8 + $0x48] sm:$0xff] }
  0xc0   :  { %544 = vmatmul.bf16.vlgmr.msrb.gmra.mxu3 %v420_v45 }
  0xc1   :  { %v345_v46 = vpop.f32.mrf.mxu3  ;;  %689 = vmatpush.bf16.msra.mxu2 %v1309_v47  ;;  %1338 = vmatpush.bf16.msra.mxu3 %v1309_v47 }
  0xc2   :  { %v346_v52 = vadd.f32 %v1512_v30, %v345_v46 }
  0xc3   :  { %v287_v48 = vpop.f32.mrf.mxu0 }
  0xc4   :  { %v288_v49 = vadd.f32 %v1512_v30, %v287_v48  ;;  %v386_v55 = vmax.f32 %v346_v52, 0.0 }
  0xc6   :  { %v363_v51 = vmax.f32 %v288_v49, 0.0  ;;  %v1308_v49 = vld [vmem:[#allocation8 + $0x40] sm:$0xff] }
  0xc7   :  { %690 = vmatpush.bf16.msra.mxu2 %v1308_v49  ;;  %1339 = vmatpush.bf16.msra.mxu3 %v1308_v49 }
  0xc8   :  { %v409_v53 = vpack.c.bf16 %v363_v51, %v362_v50 }
  0xc9   :  { %v347_v54 = vpop.f32.mrf.mxu3 }
  0xca   :  { %489 = vmatmul.bf16.gmra.mxu1 %v409_v53  ;;  %v348_v57 = vadd.f32 %v1512_v30, %v347_v54 }
  0xcb   :  { %v290_v58 = vpop.f32.mrf.mxu0 }
  0xcc   :  { %v387_v59 = vmax.f32 %v348_v57, 0.0  ;;  %v291_v61 = vadd.f32 %v1512_v30, %v290_v58 }
  0xce   :  { %329 = vmatmul.bf16.gmra.mxu0 %v1286_v56  ;;  %v421_v60 = vpack.c.bf16 %v387_v59, %v386_v55  ;;  %v364_v0 = vmax.f32 %v291_v61, 0.0 }
  0xd0   :  { %549 = vmatmul.bf16.gmra.mxu3 %v421_v60 }
  0xd1   :  { %v350_v29 = vpop.f32.mrf.mxu3 }
  0xd2   :  { %v351_v35 = vadd.f32 %v1512_v30, %v350_v29 }
  0xd3   :  { %v292_v62 = vpop.f32.mrf.mxu0 }
  0xd4   :  { %v293_v63 = vadd.f32 %v1512_v30, %v292_v62  ;;  %v388_v41 = vmax.f32 %v351_v35, 0.0 }
  0xd6   :  { %v365_v1 = vmax.f32 %v293_v63, 0.0 }
  0xd8   :  { %v410_v2 = vpack.c.bf16 %v365_v1, %v364_v0 }
  0xd9   :  { %v352_v39 = vpop.f32.mrf.mxu3 }
  0xda   :  { %494 = vmatmul.bf16.gmra.mxu1 %v410_v2  ;;  %v353_v42 = vadd.f32 %v1512_v30, %v352_v39 }
  0xdb   :  { %v295_v4 = vpop.f32.mrf.mxu0 }
  0xdc   :  { %v296_v5 = vadd.f32 %v1512_v30, %v295_v4  ;;  %v389_v44 = vmax.f32 %v353_v42, 0.0 }
  0xde   :  { %334 = vmatmul.bf16.gmra.mxu0 %v1287_v3  ;;  %v366_v8 = vmax.f32 %v296_v5, 0.0  ;;  %v422_v46 = vpack.c.bf16 %v389_v44, %v388_v41 }
  0xe0   :  { %554 = vmatmul.bf16.gmra.mxu3 %v422_v46 }
  0xe1   :  { %v355_v48 = vpop.f32.mrf.mxu3 }
  0xe2   :  { %v356_v53 = vadd.f32 %v1512_v30, %v355_v48 }
  0xe3   :  { %v297_v6 = vpop.f32.mrf.mxu0 }
  0xe4   :  { %v298_v7 = vadd.f32 %v1512_v30, %v297_v6  ;;  %v390_v58 = vmax.f32 %v356_v53, 0.0  ;;  %v1543_v6 = vld [vmem:[%s1792_s4] ss:$0 sm:$0xff] }
  0xe6   :  { %v367_v9 = vmax.f32 %v298_v7, 0.0 }
  0xe8   :  { %v411_v10 = vpack.c.bf16 %v367_v9, %v366_v8 }
  0xe9   :  { %v357_v56 = vpop.f32.mrf.mxu3 }
  0xea   :  { %499 = vmatmul.bf16.gmra.mxu1 %v411_v10  ;;  %v358_v59 = vadd.f32 %v1512_v30, %v357_v56 }
  0xeb   :  { %v300_v11 = vpop.f32.mrf.mxu0 }
  0xec   :  { %v301_v12 = vadd.f32 %v1512_v30, %v300_v11  ;;  %v391_v60 = vmax.f32 %v358_v59, 0.0 }
  0xee   :  { %v368_v15 = vmax.f32 %v301_v12, 0.0  ;;  %v423_v62 = vpack.c.bf16 %v391_v60, %v390_v58 }
  0xf0   :  { %559 = vmatmul.bf16.gmra.mxu3 %v423_v62 }
  0xf3   :  { %v302_v13 = vpop.f32.mrf.mxu0 }
  0xf4   :  { %v303_v14 = vadd.f32 %v1512_v30, %v302_v13 }
  0xf6   :  { %v369_v16 = vmax.f32 %v303_v14, 0.0 }
  0xf8   :  { %v412_v17 = vpack.c.bf16 %v369_v16, %v368_v15 }
  0xfa   :  { %504 = vmatmul.bf16.gmra.mxu1 %v412_v17 }
  0xfb   :  { %v305_v18 = vpop.f32.mrf.mxu0 }
  0xfc   :  { %v306_v19 = vadd.f32 %v1512_v30, %v305_v18 }
  0xfe   :  { %v370_v23 = vmax.f32 %v306_v19, 0.0 }
 0x103   :  { %v307_v20 = vpop.f32.mrf.mxu0 }
 0x104   :  { %v308_v21 = vadd.f32 %v1512_v30, %v307_v20 }
 0x106   :  { %v371_v24 = vmax.f32 %v308_v21, 0.0 }
 0x108   :  { %v413_v25 = vpack.c.bf16 %v371_v24, %v370_v23 }
 0x10a   :  { %509 = vmatmul.bf16.gmra.mxu1 %v413_v25 }
 0x10b   :  { %v310_v27 = vpop.f32.mrf.mxu0 }
 0x10c   :  { %v311_v32 = vadd.f32 %v1512_v30, %v310_v27 }
 0x10e   :  { %v372_v37 = vmax.f32 %v311_v32, 0.0 }
 0x113   :  { %v312_v33 = vpop.f32.mrf.mxu0 }
 0x114   :  { %v313_v34 = vadd.f32 %v1512_v30, %v312_v33 }
 0x116   :  { %v373_v38 = vmax.f32 %v313_v34, 0.0 }
 0x118   :  { %v414_v40 = vpack.c.bf16 %v373_v38, %v372_v37 }
 0x11a   :  { %514 = vmatmul.bf16.gmra.mxu1 %v414_v40 }
 0x11b   :  { %v315_v45 = vpop.f32.mrf.mxu0 }
 0x11c   :  { %v316_v50 = vadd.f32 %v1512_v30, %v315_v45 }
 0x11e   :  { %v374_v54 = vmax.f32 %v316_v50, 0.0 }
 0x123   :  { %v317_v51 = vpop.f32.mrf.mxu0 }
 0x124   :  { %v318_v52 = vadd.f32 %v1512_v30, %v317_v51 }
 0x126   :  { %v375_v55 = vmax.f32 %v318_v52, 0.0 }
 0x128   :  { %v415_v57 = vpack.c.bf16 %v375_v55, %v374_v54 }
 0x12a   :  { %519 = vmatmul.bf16.gmra.mxu1 %v415_v57 }
 0x12b   :  { %v320_v61 = vpop.f32.mrf.mxu0 }
 0x12c   :  { %v321_v63 = vadd.f32 %v1512_v30, %v320_v61 }
 0x12e   :  { %v376_v2 = vmax.f32 %v321_v63, 0.0 }
 0x133   :  { %v322_v0 = vpop.f32.mrf.mxu0 }
 0x134   :  { %v323_v1 = vadd.f32 %v1512_v30, %v322_v0 }
 0x136   :  { %v377_v3 = vmax.f32 %v323_v1, 0.0 }
 0x137   :  { %v485_v4 = vpop.f32.mrf.mxu1 }
 0x138   :  { %v416_v5 = vpack.c.bf16 %v377_v3, %v376_v2  ;;  %v486_v8 = vadd.f32 %v1543_v6, %v485_v4 }
 0x13a   :  { %524 = vmatmul.bf16.gmra.mxu1 %v416_v5  ;;  %v565_v11 = vmax.f32 %v486_v8, 0.0 }
 0x13b   :  { %v325_v7 = vpop.f32.mrf.mxu0 }
 0x13c   :  { %v326_v12 = vadd.f32 %v1512_v30, %v325_v7 }
 0x13e   :  { %v378_v18 = vmax.f32 %v326_v12, 0.0 }
 0x13f   :  { %v487_v9 = vpop.f32.mrf.mxu1 }
 0x140   :  { %v488_v10 = vadd.f32 %v1543_v6, %v487_v9 }
 0x142   :  { %v566_v13 = vmax.f32 %v488_v10, 0.0 }
 0x143   :  { %v327_v14 = vpop.f32.mrf.mxu0  ;;  %v545_v15 = vpop.f32.mrf.mxu3 }
 0x144   :  { %v328_v16 = vadd.f32 %v1512_v30, %v327_v14  ;;  %v614_v17 = vpack.c.bf16 %v566_v13, %v565_v11  ;;  %v546_v22 = vadd.f32 %v1543_v6, %v545_v15 }
 0x146   :  { %v379_v19 = vmax.f32 %v328_v16, 0.0  ;;  %691 = vmatmul.bf16.vlgmr.msra.gmra.mxu2 %v614_v17  ;;  %v589_v25 = vmax.f32 %v546_v22, 0.0 }
 0x147   :  { %v490_v20 = vpop.f32.mrf.mxu1 }
 0x148   :  { %v417_v21 = vpack.c.bf16 %v379_v19, %v378_v18  ;;  %v491_v27 = vadd.f32 %v1543_v6, %v490_v20 }
 0x14a   :  { %529 = vmatmul.bf16.gmra.mxu1 %v417_v21  ;;  %v567_v33 = vmax.f32 %v491_v27, 0.0 }
 0x14b   :  { %v330_v23 = vpop.f32.mrf.mxu0  ;;  %v547_v24 = vpop.f32.mrf.mxu3 }
 0x14c   :  { %v548_v26 = vadd.f32 %v1543_v6, %v547_v24  ;;  %v331_v34 = vadd.f32 %v1512_v30, %v330_v23 }
 0x14e   :  { %v590_v28 = vmax.f32 %v548_v26, 0.0  ;;  %v380_v40 = vmax.f32 %v331_v34, 0.0 }
 0x14f   :  { %v492_v29 = vpop.f32.mrf.mxu1 }
 0x150   :  { %v493_v31 = vadd.f32 %v1543_v6, %v492_v29  ;;  %v626_v32 = vpack.c.bf16 %v590_v28, %v589_v25 }
 0x152   :  { %v568_v35 = vmax.f32 %v493_v31, 0.0  ;;  %751 = vmatmul.bf16.vlgmr.msra.gmra.mxu3 %v626_v32 }
 0x153   :  { %v332_v36 = vpop.f32.mrf.mxu0  ;;  %v550_v37 = vpop.f32.mrf.mxu3 }
 0x154   :  { %v333_v38 = vadd.f32 %v1512_v30, %v332_v36  ;;  %v615_v39 = vpack.c.bf16 %v568_v35, %v567_v33  ;;  %v551_v44 = vadd.f32 %v1543_v6, %v550_v37 }
 0x156   :  { %v381_v41 = vmax.f32 %v333_v38, 0.0  ;;  %696 = vmatmul.bf16.gmra.mxu2 %v615_v39  ;;  %v591_v47 = vmax.f32 %v551_v44, 0.0 }
 0x157   :  { %v495_v42 = vpop.f32.mrf.mxu1 }
 0x158   :  { %v418_v43 = vpack.c.bf16 %v381_v41, %v380_v40  ;;  %v496_v49 = vadd.f32 %v1543_v6, %v495_v42 }
 0x15a   :  { %534 = vmatmul.bf16.gmra.mxu1 %v418_v43  ;;  %v569_v54 = vmax.f32 %v496_v49, 0.0 }
 0x15b   :  { %v335_v45 = vpop.f32.mrf.mxu0  ;;  %v552_v46 = vpop.f32.mrf.mxu3 }
 0x15c   :  { %v553_v48 = vadd.f32 %v1543_v6, %v552_v46  ;;  %v336_v55 = vadd.f32 %v1512_v30, %v335_v45 }
 0x15e   :  { %v592_v50 = vmax.f32 %v553_v48, 0.0  ;;  %v382_v60 = vmax.f32 %v336_v55, 0.0 }
 0x15f   :  { %v497_v51 = vpop.f32.mrf.mxu1 }
 0x160   :  { %v498_v52 = vadd.f32 %v1543_v6, %v497_v51  ;;  %v627_v53 = vpack.c.bf16 %v592_v50, %v591_v47 }
 0x162   :  { %v570_v56 = vmax.f32 %v498_v52, 0.0  ;;  %756 = vmatmul.bf16.gmra.mxu3 %v627_v53  ;;  %v1580_v53 = vld [vmem:[%s1792_s4 + $0x1] ss:$0 sm:$0xff] }
 0x163   :  { %v337_v57 = vpop.f32.mrf.mxu0  ;;  %v555_v27 = vpop.f32.mrf.mxu3 }
 0x164   :  { %v338_v58 = vadd.f32 %v1512_v30, %v337_v57  ;;  %v616_v59 = vpack.c.bf16 %v570_v56, %v569_v54  ;;  %v556_v37 = vadd.f32 %v1543_v6, %v555_v27 }
 0x166   :  { %v383_v61 = vmax.f32 %v338_v58, 0.0  ;;  %701 = vmatmul.bf16.gmra.mxu2 %v616_v59  ;;  %v593_v40 = vmax.f32 %v556_v37, 0.0  ;;  %v1586_v59 = vld [vmem:[%s1793_s5] ss:$0 sm:$0xff] }
 0x167   :  { %v500_v62 = vpop.f32.mrf.mxu1 }
 0x168   :  { %v419_v63 = vpack.c.bf16 %v383_v61, %v382_v60  ;;  %v501_v0 = vadd.f32 %v1543_v6, %v500_v62 }
 0x16a   :  { %539 = vmatmul.bf16.gmra.mxu1 %v419_v63  ;;  %v571_v3 = vmax.f32 %v501_v0, 0.0 }
 0x16b   :  { %v557_v32 = vpop.f32.mrf.mxu3 }
 0x16c   :  { %v558_v38 = vadd.f32 %v1543_v6, %v557_v32 }
 0x16e   :  { %v594_v41 = vmax.f32 %v558_v38, 0.0 }
 0x16f   :  { %v502_v1 = vpop.f32.mrf.mxu1 }
 0x170   :  { %v503_v2 = vadd.f32 %v1543_v6, %v502_v1  ;;  %v628_v43 = vpack.c.bf16 %v594_v41, %v593_v40 }
 0x172   :  { %v572_v4 = vmax.f32 %v503_v2, 0.0  ;;  %761 = vmatmul.bf16.gmra.mxu3 %v628_v43 }
 0x173   :  { %v560_v42 = vpop.f32.mrf.mxu3 }
 0x174   :  { %v617_v5 = vpack.c.bf16 %v572_v4, %v571_v3  ;;  %v561_v51 = vadd.f32 %v1543_v6, %v560_v42 }
 0x176   :  { %706 = vmatmul.bf16.gmra.mxu2 %v617_v5  ;;  %v595_v55 = vmax.f32 %v561_v51, 0.0 }
 0x177   :  { %v505_v7 = vpop.f32.mrf.mxu1 }
 0x178   :  { %v506_v8 = vadd.f32 %v1543_v6, %v505_v7 }
 0x17a   :  { %v573_v10 = vmax.f32 %v506_v8, 0.0 }
 0x17b   :  { %v562_v49 = vpop.f32.mrf.mxu3 }
 0x17c   :  { %v563_v52 = vadd.f32 %v1543_v6, %v562_v49 }
 0x17e   :  { %v596_v56 = vmax.f32 %v563_v52, 0.0 }
 0x17f   :  { %v507_v30 = vpop.f32.mrf.mxu1 }
 0x180   :  { %v508_v9 = vadd.f32 %v1543_v6, %v507_v30  ;;  %v629_v61 = vpack.c.bf16 %v596_v56, %v595_v55 }
 0x182   :  { %v574_v11 = vmax.f32 %v508_v9, 0.0  ;;  %766 = vmatmul.bf16.gmra.mxu3 %v629_v61 }
 0x184   :  { %v618_v12 = vpack.c.bf16 %v574_v11, %v573_v10 }
 0x186   :  { %711 = vmatmul.bf16.gmra.mxu2 %v618_v12 }
 0x187   :  { %v510_v13 = vpop.f32.mrf.mxu1 }
 0x188   :  { %v511_v14 = vadd.f32 %v1543_v6, %v510_v13 }
 0x18a   :  { %v575_v17 = vmax.f32 %v511_v14, 0.0 }
 0x18f   :  { %v512_v15 = vpop.f32.mrf.mxu1 }
 0x190   :  { %v513_v16 = vadd.f32 %v1543_v6, %v512_v15 }
 0x192   :  { %v576_v18 = vmax.f32 %v513_v16, 0.0 }
 0x194   :  { %v619_v19 = vpack.c.bf16 %v576_v18, %v575_v17 }
 0x196   :  { %716 = vmatmul.bf16.gmra.mxu2 %v619_v19 }
 0x197   :  { %v515_v20 = vpop.f32.mrf.mxu1 }
 0x198   :  { %v516_v21 = vadd.f32 %v1543_v6, %v515_v20 }
 0x19a   :  { %v577_v24 = vmax.f32 %v516_v21, 0.0 }
 0x19f   :  { %v517_v22 = vpop.f32.mrf.mxu1 }
 0x1a0   :  { %v518_v23 = vadd.f32 %v1543_v6, %v517_v22 }
 0x1a2   :  { %v578_v25 = vmax.f32 %v518_v23, 0.0 }
 0x1a4   :  { %v620_v26 = vpack.c.bf16 %v578_v25, %v577_v24 }
 0x1a6   :  { %721 = vmatmul.bf16.gmra.mxu2 %v620_v26 }
 0x1a7   :  { %v520_v28 = vpop.f32.mrf.mxu1 }
 0x1a8   :  { %v521_v29 = vadd.f32 %v1543_v6, %v520_v28 }
 0x1aa   :  { %v579_v34 = vmax.f32 %v521_v29, 0.0 }
 0x1af   :  { %v522_v31 = vpop.f32.mrf.mxu1 }
 0x1b0   :  { %v523_v33 = vadd.f32 %v1543_v6, %v522_v31 }
 0x1b2   :  { %v580_v35 = vmax.f32 %v523_v33, 0.0 }
 0x1b4   :  { %v621_v36 = vpack.c.bf16 %v580_v35, %v579_v34 }
 0x1b6   :  { %726 = vmatmul.bf16.gmra.mxu2 %v621_v36 }
 0x1b7   :  { %v525_v39 = vpop.f32.mrf.mxu1 }
 0x1b8   :  { %v526_v44 = vadd.f32 %v1543_v6, %v525_v39 }
 0x1ba   :  { %v581_v47 = vmax.f32 %v526_v44, 0.0 }
 0x1bf   :  { %v527_v45 = vpop.f32.mrf.mxu1 }
 0x1c0   :  { %v528_v46 = vadd.f32 %v1543_v6, %v527_v45 }
 0x1c2   :  { %v582_v48 = vmax.f32 %v528_v46, 0.0 }
 0x1c4   :  { %v622_v50 = vpack.c.bf16 %v582_v48, %v581_v47 }
 0x1c6   :  { %731 = vmatmul.bf16.gmra.mxu2 %v622_v50 }
 0x1c7   :  { %v530_v54 = vpop.f32.mrf.mxu1 }
 0x1c8   :  { %v531_v62 = vadd.f32 %v1543_v6, %v530_v54 }
 0x1c9   :  { %v692_v57 = vpop.f32.mrf.mxu2 }
 0x1ca   :  { %v693_v58 = vadd.f32 %v1580_v53, %v692_v57  ;;  %v583_v3 = vmax.f32 %v531_v62, 0.0 }
 0x1cc   :  { %v772_v60 = vmax.f32 %v693_v58, 0.0 }
 0x1ce   :  { %v808_v63 = vmul.f32 %v1586_v59, %v772_v60 }
 0x1cf   :  { %v532_v0 = vpop.f32.mrf.mxu1 }
 0x1d0   :  { %v533_v1 = vadd.f32 %v1543_v6, %v532_v0  ;;  %840 = vadd.xlane.f32.xlu0 %v808_v63 }
 0x1d1   :  { %v694_v2 = vpop.f32.mrf.mxu2 }
 0x1d2   :  { %v584_v4 = vmax.f32 %v533_v1, 0.0  ;;  %v695_v5 = vadd.f32 %v1580_v53, %v694_v2 }
 0x1d4   :  { %v773_v7 = vmax.f32 %v695_v5, 0.0  ;;  %v623_v8 = vpack.c.bf16 %v584_v4, %v583_v3 }
 0x1d5   :  { %v752_v30 = vpop.f32.mrf.mxu3 }
 0x1d6   :  { %736 = vmatmul.bf16.gmra.mxu2 %v623_v8  ;;  %v809_v9 = vmul.f32 %v1586_v59, %v773_v7  ;;  %v753_v10 = vadd.f32 %v1580_v53, %v752_v30 }
 0x1d7   :  { %v535_v11 = vpop.f32.mrf.mxu1 }
 0x1d8   :  { %842 = vadd.xlane.f32.xlu0 %v809_v9  ;;  %v796_v12 = vmax.f32 %v753_v10, 0.0  ;;  %v536_v18 = vadd.f32 %v1543_v6, %v535_v11 }
 0x1d9   :  { %v697_v13 = vpop.f32.mrf.mxu2 }
 0x1da   :  { %v698_v14 = vadd.f32 %v1580_v53, %v697_v13  ;;  %v832_v15 = vmul.f32 %v1586_v59, %v796_v12  ;;  %v585_v25 = vmax.f32 %v536_v18, 0.0 }
 0x1dc   :  { %v774_v16 = vmax.f32 %v698_v14, 0.0  ;;  %888 = vadd.xlane.f32.xlu2 %v832_v15 }
 0x1dd   :  { %v754_v17 = vpop.f32.mrf.mxu3 }
 0x1de   :  { %v810_v19 = vmul.f32 %v1586_v59, %v774_v16  ;;  %v755_v20 = vadd.f32 %v1580_v53, %v754_v17 }
 0x1df   :  { %v537_v21 = vpop.f32.mrf.mxu1 }
 0x1e0   :  { %v538_v22 = vadd.f32 %v1543_v6, %v537_v21  ;;  %844 = vadd.xlane.f32.xlu1 %v810_v19  ;;  %v797_v23 = vmax.f32 %v755_v20, 0.0 }
 0x1e1   :  { %v699_v24 = vpop.f32.mrf.mxu2 }
 0x1e2   :  { %v586_v26 = vmax.f32 %v538_v22, 0.0  ;;  %v700_v27 = vadd.f32 %v1580_v53, %v699_v24  ;;  %v833_v31 = vmul.f32 %v1586_v59, %v797_v23 }
 0x1e4   :  { %v775_v28 = vmax.f32 %v700_v27, 0.0  ;;  %v624_v29 = vpack.c.bf16 %v586_v26, %v585_v25 }
 0x1e5   :  { %v757_v32 = vpop.f32.mrf.mxu3 }
 0x1e6   :  { %741 = vmatmul.bf16.gmra.mxu2 %v624_v29  ;;  %v811_v33 = vmul.f32 %v1586_v59, %v775_v28  ;;  %v758_v34 = vadd.f32 %v1580_v53, %v757_v32 }
 0x1e7   :  { %v540_v35 = vpop.f32.mrf.mxu1 }
 0x1e8   :  { %846 = vadd.xlane.f32.xlu0 %v811_v33  ;;  %890 = vadd.xlane.f32.xlu1 %v833_v31  ;;  %v798_v36 = vmax.f32 %v758_v34, 0.0  ;;  %v541_v41 = vadd.f32 %v1543_v6, %v540_v35 }
 0x1e9   :  { %v702_v37 = vpop.f32.mrf.mxu2 }
 0x1ea   :  { %v703_v38 = vadd.f32 %v1580_v53, %v702_v37  ;;  %v834_v40 = vmul.f32 %v1586_v59, %v798_v36  ;;  %v587_v46 = vmax.f32 %v541_v41, 0.0 }
 0x1ec   :  { %v776_v39 = vmax.f32 %v703_v38, 0.0 }
 0x1ed   :  { %v759_v33 = vpop.f32.mrf.mxu3 }
 0x1ee   :  { %v812_v42 = vmul.f32 %v1586_v59, %v776_v39 }
 0x1ef   :  { %v542_v43 = vpop.f32.mrf.mxu1 }
 0x1f0   :  { %v543_v44 = vadd.f32 %v1543_v6, %v542_v43  ;;  %848 = vadd.xlane.f32.xlu2 %v812_v42  ;;  %892 = vadd.xlane.f32.xlu0 %v834_v40 }
 0x1f1   :  { %v704_v45 = vpop.f32.mrf.mxu2 }
 0x1f2   :  { %v588_v47 = vmax.f32 %v543_v44, 0.0  ;;  %v705_v48 = vadd.f32 %v1580_v53, %v704_v45  ;;  %v760_v45 = vadd.f32 %v1580_v53, %v759_v33  ;;  %v938_v33 = vlaneseq }
 0x1f4   :  { %v777_v49 = vmax.f32 %v705_v48, 0.0  ;;  %v625_v50 = vpack.c.bf16 %v588_v47, %v587_v46 }
 0x1f5   :  { %v762_v38 = vpop.f32.mrf.mxu3 }
 0x1f6   :  { %746 = vmatmul.bf16.gmra.mxu2 %v625_v50  ;;  %v813_v51 = vmul.f32 %v1586_v59, %v777_v49  ;;  %v799_v50 = vmax.f32 %v760_v45, 0.0 }
 0x1f8   :  { %850 = vadd.xlane.f32.xlu1 %v813_v51 }
 0x1f9   :  { %v707_v52 = vpop.f32.mrf.mxu2 }
 0x1fa   :  { %v708_v54 = vadd.f32 %v1580_v53, %v707_v52 }
 0x1fc   :  { %v778_v55 = vmax.f32 %v708_v54, 0.0 }
 0x1fd   :  { %v764_v48 = vpop.f32.mrf.mxu3 }
 0x1fe   :  { %v814_v56 = vmul.f32 %v1586_v59, %v778_v55  ;;  %v763_v55 = vadd.f32 %v1580_v53, %v762_v38 }
 0x200   :  { %852 = vadd.xlane.f32.xlu0 %v814_v56  ;;  %v835_v56 = vmul.f32 %v1586_v59, %v799_v50  ;;  %v1458_v50 = vmov 0.0  }
 0x201   :  { %v709_v6 = vpop.f32.mrf.mxu2 }
 0x202   :  { %v710_v57 = vadd.f32 %v1580_v53, %v709_v6 }
 0x204   :  { %v779_v58 = vmax.f32 %v710_v57, 0.0 }
 0x206   :  { %v815_v60 = vmul.f32 %v1586_v59, %v779_v58  ;;  %v767_v58 = vpop.f32.mrf.mxu3 }
 0x208   :  { %854 = vadd.xlane.f32.xlu2 %v815_v60 }
 0x209   :  { %v712_v61 = vpop.f32.mrf.mxu2 }
 0x20a   :  { %v713_v62 = vadd.f32 %v1580_v53, %v712_v61  ;;  %v800_v61 = vmax.f32 %v763_v55, 0.0 }
 0x20c   :  { %v780_v63 = vmax.f32 %v713_v62, 0.0 }
 0x20e   :  { %v816_v0 = vmul.f32 %v1586_v59, %v780_v63 }
 0x210   :  { %856 = vadd.xlane.f32.xlu1 %v816_v0 }
 0x211   :  { %v714_v1 = vpop.f32.mrf.mxu2 }
 0x212   :  { %v715_v2 = vadd.f32 %v1580_v53, %v714_v1 }
 0x214   :  { %v781_v3 = vmax.f32 %v715_v2, 0.0  ;;  %v768_v2 = vadd.f32 %v1580_v53, %v767_v58 }
 0x216   :  { %v817_v4 = vmul.f32 %v1586_v59, %v781_v3  ;;  %v836_v3 = vmul.f32 %v1586_v59, %v800_v61 }
 0x218   :  { %858 = vadd.xlane.f32.xlu0 %v817_v4 }
 0x219   :  { %v717_v5 = vpop.f32.mrf.mxu2 }
 0x21a   :  { %v718_v7 = vadd.f32 %v1580_v53, %v717_v5  ;;  %v765_v5 = vadd.f32 %v1580_v53, %v764_v48 }
 0x21c   :  { %v782_v8 = vmax.f32 %v718_v7, 0.0 }
 0x21e   :  { %v818_v30 = vmul.f32 %v1586_v59, %v782_v8  ;;  %v802_v8 = vmax.f32 %v768_v2, 0.0 }
 0x220   :  { %860 = vadd.xlane.f32.xlu2 %v818_v30  ;;  %v801_v30 = vmax.f32 %v765_v5, 0.0 }
 0x221   :  { %v719_v9 = vpop.f32.mrf.mxu2 }
 0x222   :  { %v720_v10 = vadd.f32 %v1580_v53, %v719_v9  ;;  %v769_v9 = vpop.f32.mrf.mxu3 }
 0x224   :  { %v783_v11 = vmax.f32 %v720_v10, 0.0  ;;  %v770_v10 = vadd.f32 %v1580_v53, %v769_v9 }
 0x226   :  { %v819_v12 = vmul.f32 %v1586_v59, %v783_v11  ;;  %v838_v11 = vmul.f32 %v1586_v59, %v802_v8 }
 0x228   :  { %862 = vadd.xlane.f32.xlu1 %v819_v12 }
 0x229   :  { %v722_v13 = vpop.f32.mrf.mxu2 }
 0x22a   :  { %v723_v39 = vadd.f32 %v1580_v53, %v722_v13 }
 0x22c   :  { %v784_v42 = vmax.f32 %v723_v39, 0.0  ;;  %v1681_v39 = vand.u32 127, %v938_v33 }
 0x22e   :  { %v820_v47 = vmul.f32 %v1586_v59, %v784_v42 }
 0x231   :  { %v724_v14 = vpop.f32.mrf.mxu2 }
 0x232   :  { %v725_v54 = vadd.f32 %v1580_v53, %v724_v14  ;;  %v837_v14 = vmul.f32 %v1586_v59, %v801_v30 }
 0x234   :  { %v785_v57 = vmax.f32 %v725_v54, 0.0 }
 0x236   :  { %v821_v0 = vmul.f32 %v1586_v59, %v785_v57 }
 0x239   :  { %v727_v15 = vpop.f32.mrf.mxu2 }
 0x23a   :  { %v728_v1 = vadd.f32 %v1580_v53, %v727_v15  ;;  %v803_v15 = vmax.f32 %v770_v10, 0.0 }
 0x23c   :  { %v786_v7 = vmax.f32 %v728_v1, 0.0 }
 0x23e   :  { %v822_v12 = vmul.f32 %v1586_v59, %v786_v7 }
 0x241   :  { %v1623_v16 = vpop.f32.mrf.mxu2 }
 0x242   :  { %v730_v13 = vadd.f32 %v1580_v53, %v1623_v16 }
 0x249   :  { %v732_v17 = vpop.f32.mrf.mxu2 }
 0x24a   :  { %v733_v18 = vadd.f32 %v1580_v53, %v732_v17  ;;  %v787_v17 = vmax.f32 %v730_v13, 0.0 }
 0x24c   :  { %v788_v19 = vmax.f32 %v733_v18, 0.0  ;;  %v839_v18 = vmul.f32 %v1586_v59, %v803_v15 }
 0x24e   :  { %v824_v20 = vmul.f32 %v1586_v59, %v788_v19  ;;  %v823_v19 = vmul.f32 %v1586_v59, %v787_v17 }
 0x250   :  { %872 = vadd.xlane.f32.xlu1 %v824_v20  ;;  %v841_v20 = vpop.xlane.xlu0 %840 }
 0x251   :  { %v734_v21 = vpop.f32.mrf.mxu2 }
 0x252   :  { %v735_v22 = vadd.f32 %v1580_v53, %v734_v21  ;;  %v1660_v21 = vpop.xlane.xlu2 %888 }
 0x254   :  { %v789_v23 = vmax.f32 %v735_v22, 0.0  ;;  %v845_v22 = vpop.xlane.xlu1 %844 }
 0x256   :  { %v825_v24 = vmul.f32 %v1586_v59, %v789_v23 }
 0x258   :  { %874 = vadd.xlane.f32.xlu2 %v825_v24  ;;  %v843_v23 = vpop.xlane.xlu0 %842 }
 0x259   :  { %v737_v25 = vpop.f32.mrf.mxu2 }
 0x25a   :  { %v738_v26 = vadd.f32 %v1580_v53, %v737_v25 }
 0x25c   :  { %v790_v27 = vmax.f32 %v738_v26, 0.0 }
 0x25e   :  { %v826_v28 = vmul.f32 %v1586_v59, %v790_v27 }
 0x260   :  { %876 = vadd.xlane.f32.xlu2 %v826_v28  ;;  %v847_v16 = vpop.xlane.xlu0 %846 }
 0x261   :  { %v739_v29 = vpop.f32.mrf.mxu2 }
 0x262   :  { %v740_v31 = vadd.f32 %v1580_v53, %v739_v29 }
 0x263   :  { %v849_v24 = vpop.xlane.xlu2 %848 }
 0x264   :  { %v791_v32 = vmax.f32 %v740_v31, 0.0 }
 0x266   :  { %v827_v34 = vmul.f32 %v1586_v59, %v791_v32 }
 0x268   :  { %878 = vadd.xlane.f32.xlu1 %v827_v34  ;;  %v1666_v27 = vpop.xlane.xlu0 %892 }
 0x269   :  { %v742_v35 = vpop.f32.mrf.mxu2 }
 0x26a   :  { %v743_v36 = vadd.f32 %v1580_v53, %v742_v35  ;;  %v1678_v35 = vshrl.u32 %v938_v33, 7 }
 0x26c   :  { %v792_v37 = vmax.f32 %v743_v36, 0.0  ;;  %v940_v38 = vadd.s32 8, %v1678_v35  ;;  %v947_v42 = vadd.s32 64, %v1678_v35  ;;  %vm957_vm1 = vcmp.eq.s32.totalorder %v1678_v35, %v1681_v39 }
 0x26d   :  { %v1260_v55 = vsel %vm957_vm1, 1.0, %v1458_v50  ;;  %v945_v1 = vadd.s32 48, %v1678_v35  ;;  %v946_v9 = vadd.s32 56, %v1678_v35 }
 0x26e   :  { %v828_v40 = vmul.f32 %v1586_v59, %v792_v37  ;;  %vm958_vm0 = vcmp.eq.s32.totalorder %v940_v38, %v1681_v39  ;;  %vm965_vm4 = vcmp.eq.s32.totalorder %v947_v42, %v1681_v39 }
 0x26f   :  { %vm963_vm7 = vcmp.eq.s32.totalorder %v945_v1, %v1681_v39  ;;  %vm964_vm8 = vcmp.eq.s32.totalorder %v946_v9, %v1681_v39 }
 0x270   :  { %880 = vadd.xlane.f32.xlu0 %v828_v40  ;;  %v941_v40 = vadd.s32 16, %v1678_v35 }
 0x271   :  { %v744_v41 = vpop.f32.mrf.mxu2 }
 0x272   :  { %v745_v43 = vadd.f32 %v1580_v53, %v744_v41  ;;  %v942_v41 = vadd.s32 24, %v1678_v35  ;;  %vm959_vm2 = vcmp.eq.s32.totalorder %v941_v40, %v1681_v39 }
 0x273   :  { %v1672_v31 = vpop.xlane.xlu0 %852 }
 0x274   :  { %v793_v44 = vmax.f32 %v745_v43, 0.0  ;;  %v943_v43 = vadd.s32 32, %v1678_v35  ;;  %vm960_vm3 = vcmp.eq.s32.totalorder %v942_v41, %v1681_v39 }
 0x275   :  { %v1263_v57 = vsel %vm960_vm3, 1.0, %v1458_v50 }
 0x276   :  { %v829_v46 = vmul.f32 %v1586_v59, %v793_v44  ;;  %v1691_v44 = vstv %s1794_s6  ;;  %vm961_vm5 = vcmp.eq.s32.totalorder %v943_v43, %v1681_v39  ;;  %v1267_v43 = vsel %vm964_vm8, 1.0, %v1458_v50  ;;  %s1459_s6 = smov [#allocation9]  }
 0x277   :  { %v910_v8 = vadd.f32 %v1691_v44, %v849_v24  ;;  %v930_v17 = vadd.f32 %v1691_v44, %v1660_v21  ;;  %v1266_v21 = vsel %vm963_vm7, 1.0, %v1458_v50  ;;  %s1086_s22 = sshll.u32 %s1459_s6, 4  ;;  %s1087_s22 = int_to_ptr.vmem [resolvable:$true] %s1086_s22 }
 0x278   :  { %882 = vadd.xlane.f32.xlu2 %v829_v46  ;;  %864 = vadd.xlane.f32.xlu0 %v820_v47  ;;  %v907_v46 = vadd.f32 %v1691_v44, %v843_v23  ;;  %v944_v47 = vadd.s32 40, %v1678_v35 }
 0x279   :  { %v747_v49 = vpop.f32.mrf.mxu2 }
 0x27a   :  { %v748_v51 = vadd.f32 %v1580_v53, %v747_v49  ;;  %vm962_vm6 = vcmp.eq.s32.totalorder %v944_v47, %v1681_v39 }
 0x27b   :  { %v1664_v25 = vpop.xlane.xlu2 %854  ;;  %v1265_v30 = vsel %vm962_vm6, 1.0, %v1458_v50 }
 0x27c   :  { %v794_v52 = vmax.f32 %v748_v51, 0.0  ;;  %v1261_v51 = vsel %vm958_vm0, 1.0, %v1458_v50  ;;  %v913_v42 = vadd.f32 %v1691_v44, %v1664_v25 }
 0x27d   :  { %v1006_v58 = vmul.f32 %v1261_v51, %v907_v46 }
 0x27e   :  { %v830_v6 = vmul.f32 %v1586_v59, %v794_v52  ;;  %v906_v52 = vadd.f32 %v1691_v44, %v841_v20 }
 0x280   :  { %894 = vadd.xlane.f32.xlu2 %v835_v56  ;;  %884 = vadd.xlane.f32.xlu1 %v830_v6  ;;  %v1262_v56 = vsel %vm959_vm2, 1.0, %v1458_v50  ;;  %v908_v6 = vadd.f32 %v1691_v44, %v845_v22  ;;  %v1005_v2 = vmul.f32 %v1260_v55, %v906_v52  ;;  %v949_v22 = vadd.s32 80, %v1678_v35 }
 0x281   :  { %v749_v60 = vpop.f32.mrf.mxu2 }
 0x282   :  { %v750_v62 = vadd.f32 %v1580_v53, %v749_v60  ;;  %v1662_v53 = vpop.xlane.xlu1 %890  ;;  %v1007_v7 = vmul.f32 %v1262_v56, %v908_v6  ;;  %v1021_v10 = vadd.f32 %v1006_v58, %v1005_v2  ;;  %vm967_vm10 = vcmp.eq.s32.totalorder %v949_v22, %v1681_v39 }
 0x283   :  { %v1012_v6 = vmul.f32 %v1267_v43, %v913_v42  ;;  %v951_v58 = vadd.s32 96, %v1678_v35 }
 0x284   :  { %v795_v63 = vmax.f32 %v750_v62, 0.0  ;;  %v1712_v62 = vsel %vm965_vm4, 1.0, %v1458_v50 }
 0x285   :  { %vm969_vm12 = vcmp.eq.s32.totalorder %v951_v58, %v1681_v39 }
 0x286   :  { %v831_v4 = vmul.f32 %v1586_v59, %v795_v63  ;;  %v909_v63 = vadd.f32 %v1691_v44, %v847_v16 }
 0x288   :  { %866 = vadd.xlane.f32.xlu2 %v821_v0  ;;  %896 = vadd.xlane.f32.xlu1 %v836_v3  ;;  %v1264_v0 = vsel %vm961_vm5, 1.0, %v1458_v50  ;;  %v948_v3 = vadd.s32 72, %v1678_v35 }
 0x289   :  { %886 = vadd.xlane.f32.xlu0 %v831_v4  ;;  %v1009_v33 = vmul.f32 %v1264_v0, %v910_v8 }
 0x28a   :  { %v851_v26 = vpop.xlane.xlu1 %850  ;;  %vm966_vm9 = vcmp.eq.s32.totalorder %v948_v3, %v1681_v39 }
 0x28b   :  { %v1676_v34 = vpop.xlane.xlu0 %858  ;;  %v1269_v52 = vsel %vm966_vm9, 1.0, %v1458_v50 }
 0x290   :  { %900 = vadd.xlane.f32.xlu2 %v838_v11  ;;  %868 = vadd.xlane.f32.xlu1 %v822_v12 }
 0x291   :  { %898 = vadd.xlane.f32.xlu0 %v837_v14 }
 0x292   :  { %v1670_v29 = vpop.xlane.xlu1 %856 }
 0x293   :  { %v1668_v28 = vpop.xlane.xlu2 %860 }
 0x298   :  { %902 = vadd.xlane.f32.xlu1 %v839_v18  ;;  %v1008_v18 = vmul.f32 %v1263_v57, %v909_v63  ;;  %v1270_v63 = vsel %vm967_vm10, 1.0, %v1458_v50 }
 0x299   :  { %870 = vadd.xlane.f32.xlu0 %v823_v19  ;;  %v911_v19 = vadd.f32 %v1691_v44, %v851_v26 }
 0x29b   :  { %v1674_v32 = vpop.xlane.xlu1 %862  ;;  %v1010_v41 = vmul.f32 %v1265_v30, %v911_v19 }
 0x29c   :  { %v917_v9 = vadd.f32 %v1691_v44, %v1674_v32 }
 0x2c3   :  { %v873_v36 = vpop.xlane.xlu1 %872 }
 0x2c4   :  { %v922_v60 = vadd.f32 %v1691_v44, %v873_v36  ;;  %v912_v36 = vadd.f32 %v1691_v44, %v1672_v31 }
 0x2c6   :  { %v1043_v11 = vmul.f32 %v1260_v55, %v922_v60  ;;  %v1011_v47 = vmul.f32 %v1266_v21, %v912_v36 }
 0x2cb   :  { %v875_v59 = vpop.xlane.xlu2 %874 }
 0x2cc   :  { %v923_v54 = vadd.f32 %v1691_v44, %v875_v59  ;;  %v1022_v59 = vadd.f32 %v1021_v10, %v1007_v7 }
 0x2ce   :  { %v1044_v4 = vmul.f32 %v1261_v51, %v923_v54  ;;  %v1023_v40 = vadd.f32 %v1022_v59, %v1008_v18  ;;  %v1051_v51 = vmul.f32 %v1712_v62, %v930_v17  ;;  %v1272_v17 = vsel %vm969_vm12, 1.0, %v1458_v50 }
 0x2d0   :  { %v1059_v23 = vadd.f32 %v1044_v4, %v1043_v11  ;;  %v1024_v46 = vadd.f32 %v1023_v40, %v1009_v33  ;;  %v932_v4 = vadd.f32 %v1691_v44, %v1666_v27  ;;  %v953_v11 = vadd.s32 112, %v1678_v35 }
 0x2d2   :  { %v1053_v22 = vmul.f32 %v1270_v63, %v932_v4  ;;  %vm971_vm14 = vcmp.eq.s32.totalorder %v953_v11, %v1681_v39 }
 0x2d3   :  { %v877_v37 = vpop.xlane.xlu2 %876  ;;  %v1274_v42 = vsel %vm971_vm14, 1.0, %v1458_v50 }
 0x2d4   :  { %v924_v61 = vadd.f32 %v1691_v44, %v877_v37 }
 0x2d6   :  { %v1045_v12 = vmul.f32 %v1262_v56, %v924_v61  ;;  %v1025_v56 = vadd.f32 %v1024_v46, %v1010_v41 }
 0x2d8   :  { %v1060_v37 = vadd.f32 %v1059_v23, %v1045_v12  ;;  %v1026_v2 = vadd.f32 %v1025_v56, %v1011_v47 }
 0x2da   :  { %v1027_v8 = vadd.f32 %v1026_v2, %v1012_v6 }
 0x2db   :  { %v879_v48 = vpop.xlane.xlu1 %878 }
 0x2dc   :  { %v925_v5 = vadd.f32 %v1691_v44, %v879_v48  ;;  %v914_v48 = vadd.f32 %v1691_v44, %v1670_v29  ;;  %v931_v29 = vadd.f32 %v1691_v44, %v1662_v53  ;;  %v952_v53 = vadd.s32 104, %v1678_v35 }
 0x2de   :  { %v1046_v24 = vmul.f32 %v1263_v57, %v925_v5  ;;  %v915_v57 = vadd.f32 %v1691_v44, %v1676_v34  ;;  %v1013_v3 = vmul.f32 %v1712_v62, %v914_v48  ;;  %v916_v34 = vadd.f32 %v1691_v44, %v1668_v28 }
 0x2df   :  { %v1052_v62 = vmul.f32 %v1269_v52, %v931_v29  ;;  %vm970_vm13 = vcmp.eq.s32.totalorder %v952_v53, %v1681_v39 }
 0x2e0   :  { %v1061_v31 = vadd.f32 %v1060_v37, %v1046_v24  ;;  %v1028_v12 = vadd.f32 %v1027_v8, %v1013_v3 }
 0x2e3   :  { %v881_v45 = vpop.xlane.xlu0 %880 }
 0x2e4   :  { %v926_v13 = vadd.f32 %v1691_v44, %v881_v45 }
 0x2e6   :  { %v1047_v26 = vmul.f32 %v1264_v0, %v926_v13  ;;  %v1015_v13 = vmul.f32 %v1270_v63, %v916_v34 }
 0x2e8   :  { %v1062_v54 = vadd.f32 %v1061_v31, %v1047_v26 }
 0x2eb   :  { %v883_v49 = vpop.xlane.xlu2 %882  ;;  %v865_v20 = vpop.xlane.xlu0 %864 }
 0x2ec   :  { %v927_v16 = vadd.f32 %v1691_v44, %v883_v49  ;;  %v950_v49 = vadd.s32 88, %v1678_v35  ;;  %v918_v27 = vadd.f32 %v1691_v44, %v865_v20 }
 0x2ee   :  { %v1048_v45 = vmul.f32 %v1265_v30, %v927_v16  ;;  %vm968_vm11 = vcmp.eq.s32.totalorder %v950_v49, %v1681_v39  ;;  %v1014_v30 = vmul.f32 %v1269_v52, %v915_v57  ;;  %v1017_v36 = vmul.f32 %v1272_v17, %v918_v27 }
 0x2ef   :  { %v1271_v10 = vsel %vm968_vm11, 1.0, %v1458_v50 }
 0x2f0   :  { %v1063_v0 = vadd.f32 %v1062_v54, %v1048_v45  ;;  %v1029_v23 = vadd.f32 %v1028_v12, %v1014_v30  ;;  %v1016_v24 = vmul.f32 %v1271_v10, %v917_v9 }
 0x2f3   :  { %v1723_v14 = vpop.xlane.xlu2 %894  ;;  %v885_v15 = vpop.xlane.xlu1 %884 }
 0x2f4   :  { %v928_v38 = vadd.f32 %v1691_v44, %v885_v15  ;;  %v954_v15 = vadd.s32 120, %v1678_v35  ;;  %v933_v18 = vadd.f32 %v1691_v44, %v1723_v14  ;;  %v1030_v35 = vadd.f32 %v1029_v23, %v1015_v13 }
 0x2f6   :  { %v1049_v55 = vmul.f32 %v1266_v21, %v928_v38  ;;  %v1273_v21 = vsel %vm970_vm13, 1.0, %v1458_v50  ;;  %vm972_vm15 = vcmp.eq.s32.totalorder %v954_v15, %v1681_v39  ;;  %v1054_v37 = vmul.f32 %v1271_v10, %v933_v18 }
 0x2f7   :  { %v1031_v41 = vadd.f32 %v1030_v35, %v1016_v24  ;;  %v1275_v47 = vsel %vm972_vm15, 1.0, %v1458_v50 }
 0x2f8   :  { %v1064_v5 = vadd.f32 %v1063_v0, %v1049_v55 }
 0x2f9   :  { %v1032_v48 = vadd.f32 %v1031_v41, %v1017_v36 }
 0x2fb   :  { %v897_v25 = vpop.xlane.xlu1 %896  ;;  %v867_v60 = vpop.xlane.xlu2 %866 }
 0x2fc   :  { %v887_v61 = vpop.xlane.xlu0 %886  ;;  %v919_v59 = vadd.f32 %v1691_v44, %v867_v60  ;;  %v934_v33 = vadd.f32 %v1691_v44, %v897_v25 }
 0x2fd   :  { %v929_v1 = vadd.f32 %v1691_v44, %v887_v61 }
 0x2fe   :  { %v1055_v31 = vmul.f32 %v1272_v17, %v934_v33 }
 0x2ff   :  { %v1050_v7 = vmul.f32 %v1267_v43, %v929_v1  ;;  %v1018_v43 = vmul.f32 %v1273_v21, %v919_v59 }
 0x301   :  { %v1065_v28 = vadd.f32 %v1064_v5, %v1050_v7  ;;  %v1033_v25 = vadd.f32 %v1032_v48, %v1018_v43 }
 0x303   :  { %v1066_v32 = vadd.f32 %v1065_v28, %v1051_v51  ;;  %v869_v19 = vpop.xlane.xlu1 %868  ;;  %v901_v14 = vpop.xlane.xlu2 %900 }
 0x304   :  { %v899_v16 = vpop.xlane.xlu0 %898  ;;  %v920_v26 = vadd.f32 %v1691_v44, %v869_v19  ;;  %v936_v45 = vadd.f32 %v1691_v44, %v901_v14 }
 0x305   :  { %v1067_v20 = vadd.f32 %v1066_v32, %v1052_v62  ;;  %v935_v40 = vadd.f32 %v1691_v44, %v899_v16 }
 0x306   :  { %v1019_v49 = vmul.f32 %v1274_v42, %v920_v26  ;;  %v1057_v56 = vmul.f32 %v1274_v42, %v936_v45 }
 0x307   :  { %v1068_v38 = vadd.f32 %v1067_v20, %v1053_v22  ;;  %v1056_v39 = vmul.f32 %v1273_v21, %v935_v40 }
 0x308   :  { %v1034_v60 = vadd.f32 %v1033_v25, %v1019_v49 }
 0x309   :  { %v1069_v46 = vadd.f32 %v1068_v38, %v1054_v37 }
 0x30b   :  { %v1070_v51 = vadd.f32 %v1069_v46, %v1055_v31  ;;  %v903_v52 = vpop.xlane.xlu1 %902 }
 0x30c   :  { %v937_v54 = vadd.f32 %v1691_v44, %v903_v52  ;;  %v871_v55 = vpop.xlane.xlu0 %870 }
 0x30d   :  { %v1071_v6 = vadd.f32 %v1070_v51, %v1056_v39  ;;  %v921_v57 = vadd.f32 %v1691_v44, %v871_v55 }
 0x30e   :  { %v1058_v58 = vmul.f32 %v1275_v47, %v937_v54 }
 0x30f   :  { %v1072_v61 = vadd.f32 %v1071_v6, %v1057_v56  ;;  %v1020_v29 = vmul.f32 %v1275_v47, %v921_v57 }
 0x311   :  { %v1073_v63 = vadd.f32 %v1072_v61, %v1058_v58  ;;  %v1035_v0 = vadd.f32 %v1034_v60, %v1020_v29 }
 0x313   :  { %v1074_v50 = vrot.slane %v1073_v63, 4  ;;  %v1036_v1 = vrot.slane %v1035_v0, 4 }
 0x315   :  { %v1075_v2 = vadd.f32 %v1074_v50, %v1073_v63  ;;  %v1037_v3 = vadd.f32 %v1036_v1, %v1035_v0 }
 0x317   :  { %v1076_v34 = vrot.slane %v1075_v2, 2  ;;  %v1038_v4 = vrot.slane %v1037_v3, 2 }
 0x319   :  { %v1077_v5 = vadd.f32 %v1076_v34, %v1075_v2  ;;  %v1039_v53 = vadd.f32 %v1038_v4, %v1037_v3 }
 0x31b   :  { %v1040_v7 = vrot.slane %v1039_v53, 1  ;;  %v1078_v8 = vrot.slane %v1077_v5, 1 }
 0x31d   :  { %v1041_v44 = vadd.f32 %v1040_v7, %v1039_v53  ;;  %v1079_v30 = vadd.f32 %v1078_v8, %v1077_v5 }
 0x31f   :  { %1042 = vst [vmem:[#allocation9] sm:$0x1] %v1041_v44 }
 0x320   :  { %1080 = vst [vmem:[#allocation9 + $0x1] sm:$0x1] %v1079_v30 }
 0x321   :  { %1091 = dma.vmem_to_hbm [thread:$0]  %s1087_s22, 32, %s1089_s25, [#allocation5]  }
 0x322   :  { %1451 = dma.done.wait [#allocation5], 32  }
 0x323   :  { %1452 = vsyncadd [#allocation5], 4294967264 }
 0x324   :  { %1096 = vsyncpa [#allocation4], 1 }
 0x325   :  { %1097 = vsyncpa [#allocation7], 1 }
 0x326   :  { %1098 = vsyncpa [#allocation5], 1 }

// kernel: tpu_custom_call.1
= control target key start
LH: loop header
LB: loop body
LE: loop exit
PB: predicated region body
PF: predicated region fallthrough
CT: control target
= control target key end

     0   :  { %13 = vsyncpa [#allocation4], 0  ;;  %s1788_s0 = inlined_call_operand.hbm [shape: bf16[256,128], index: 0, kind: input, shape index: {}]   ;;  %s1789_s1 = inlined_call_operand.hbm [shape: bf16[128,128], index: 1, kind: input, shape index: {}]   ;;  %s1790_s2 = inlined_call_operand.vmem [shape: f32[1,128], index: 2, kind: input, shape index: {}]   ;;  %s1791_s3 = inlined_call_operand.hbm [shape: bf16[2,128,128], index: 3, kind: input, shape index: {}]   ;;  %s1792_s4 = inlined_call_operand.vmem [shape: f32[2,1,128], index: 4, kind: input, shape index: {}]   ;;  %s1793_s5 = inlined_call_operand.vmem [shape: f32[1,128], index: 5, kind: input, shape index: {}]   ;;  %s1794_s6 = inlined_call_operand.<no memory space> [shape: f32[1], index: 6, kind: input, shape index: {}]   ;;  %s1795_s7 = inlined_call_operand.hbm [shape: f32[1,2,128], index: 7, kind: output, shape index: {}]  }
   0x1   :  { %14 = vsyncpa [#allocation7], 0 }
   0x2   :  { %15 = vsyncpa [#allocation5], 0  ;;  %s33_s26 = sshll.u32 %s1789_s1, 4  ;;  %s1453_s27 = smov [#allocation6]   ;;  %s34_s26 = int_to_ptr.hbm [resolvable:$true] %s33_s26 }
   0x3   :  { %s35_s28 = sshll.u32 %s1453_s27, 4  ;;  %s20_s8 = sshll.u32 %s1788_s0, 4  ;;  %s36_s28 = int_to_ptr.vmem [resolvable:$true] %s35_s28  ;;  %s21_s8 = int_to_ptr.hbm [resolvable:$true] %s20_s8 }
   0x4   :  { %s1454_s9 = smov 64   ;;  %s1455_s10 = smov 4  }
   0x5   :  { %41 = dma.hbm_to_vmem [thread:$0]  %s34_s26, 1024, %s36_s28, [#allocation7], %s1454_s9, %s1454_s9, %s1455_s10  }
   0x6   :  { %s1456_s11 = smov [#allocation3]   ;;  %s48_s15 = sshll.u32 %s1791_s3, 4  ;;  %s49_s15 = int_to_ptr.hbm [resolvable:$true] %s48_s15 }
   0x7   :  { %s22_s12 = sshll.u32 %s1456_s11, 4  ;;  %s1457_s1 = smov [#allocation8]   ;;  %s23_s12 = int_to_ptr.vmem [resolvable:$true] %s22_s12 }
   0x8   :  { %28 = dma.hbm_to_vmem [thread:$0]  %s21_s8, 2048, %s23_s12, [#allocation4], %s1454_s9, %s1454_s9, %s1455_s10  }
   0x9   :  { %s50_s16 = sshll.u32 %s1457_s1, 4  ;;  %s51_s16 = int_to_ptr.vmem [resolvable:$true] %s50_s16 }
   0xa   :  { %56 = dma.hbm_to_vmem [thread:$0]  %s49_s15, 2048, %s51_s16, [#allocation7], %s1454_s9, %s1454_s9, %s1455_s10  }
   0xb   :  { %1447 = dma.done.wait [#allocation4], 2048  }
   0xc   :  { %1448 = vsyncadd [#allocation4], 4294965248 }
   0xd   :  { %1449 = dma.done.wait [#allocation7], 3072  }
   0xe   :  { %1450 = vsyncadd [#allocation7], 4294964224  ;;  %v1299_v0 = vld [vmem:[#allocation6 + $0x38] sm:$0xff]  ;;  %v1298_v1 = vld [vmem:[#allocation6 + $0x30] sm:$0xff]  ;;  %s1088_s25 = sshll.u32 %s1795_s7, 4  ;;  %s1089_s25 = int_to_ptr.hbm [resolvable:$true] %s1088_s25 }
   0xf   :  { %271 = vmatpush.bf16.msra.mxu0 %v1299_v0  ;;  %1316 = vmatpush.bf16.msra.mxu3 %v1299_v0  ;;  %v1297_v2 = vld [vmem:[#allocation6 + $0x28] sm:$0xff]  ;;  %v1296_v3 = vld [vmem:[#allocation6 + $0x20] sm:$0xff]  ;;  %v1295_v4 = vld [vmem:[#allocation6 + $0x18] sm:$0xff] }
  0x10   :  { %v1294_v5 = vld [vmem:[#allocation6 + $0x10] sm:$0xff]  ;;  %v1293_v6 = vld [vmem:[#allocation6 + $0x8] sm:$0xff]  ;;  %v1292_v7 = vld [vmem:[#allocation6] sm:$0xff] }
  0x11   :  { %v1276_v8 = vld [vmem:[#allocation3] sm:$0xff]  ;;  %v1277_v10 = vld [vmem:[#allocation3 + $0x8] sm:$0xff]  ;;  %v1278_v12 = vld [vmem:[#allocation3 + $0x10] sm:$0xff] }
  0x12   :  { %v1288_v9 = vld [vmem:[#allocation3 + $0x60] sm:$0xff]  ;;  %v1289_v11 = vld [vmem:[#allocation3 + $0x68] sm:$0xff]  ;;  %v1279_v13 = vld [vmem:[#allocation3 + $0x18] sm:$0xff] }
  0x13   :  { %272 = vmatpush.bf16.msra.mxu0 %v1298_v1  ;;  %1317 = vmatpush.bf16.msra.mxu3 %v1298_v1  ;;  %v1280_v14 = vld [vmem:[#allocation3 + $0x20] sm:$0xff]  ;;  %v1307_v15 = vld [vmem:[#allocation8 + $0x38] sm:$0xff]  ;;  %v1281_v16 = vld [vmem:[#allocation3 + $0x28] sm:$0xff] }
  0x14   :  { %476 = vmatpush.bf16.msra.mxu1 %v1307_v15  ;;  %v1306_v17 = vld [vmem:[#allocation8 + $0x30] sm:$0xff]  ;;  %v1305_v18 = vld [vmem:[#allocation8 + $0x28] sm:$0xff]  ;;  %v1304_v19 = vld [vmem:[#allocation8 + $0x20] sm:$0xff] }
  0x15   :  { %v1303_v20 = vld [vmem:[#allocation8 + $0x18] sm:$0xff]  ;;  %v1282_v21 = vld [vmem:[#allocation3 + $0x30] sm:$0xff]  ;;  %v1301_v24 = vld [vmem:[#allocation8 + $0x8] sm:$0xff] }
  0x16   :  { %v1290_v22 = vld [vmem:[#allocation3 + $0x70] sm:$0xff]  ;;  %v1300_v25 = vld [vmem:[#allocation8] sm:$0xff]  ;;  %v1283_v26 = vld [vmem:[#allocation3 + $0x38] sm:$0xff] }
  0x17   :  { %273 = vmatpush.bf16.msra.mxu0 %v1297_v2  ;;  %1318 = vmatpush.bf16.msra.mxu3 %v1297_v2  ;;  %v1302_v23 = vld [vmem:[#allocation8 + $0x10] sm:$0xff]  ;;  %v1291_v27 = vld [vmem:[#allocation3 + $0x78] sm:$0xff]  ;;  %v1284_v28 = vld [vmem:[#allocation3 + $0x40] sm:$0xff] }
  0x18   :  { %477 = vmatpush.bf16.msra.mxu1 %v1306_v17  ;;  %v1512_v30 = vld [vmem:[%s1790_s2] ss:$0 sm:$0xff]  ;;  %v1285_v41 = vld [vmem:[#allocation3 + $0x48] sm:$0xff]  ;;  %v1286_v56 = vld [vmem:[#allocation3 + $0x50] sm:$0xff] }
  0x1b   :  { %274 = vmatpush.bf16.msra.mxu0 %v1296_v3  ;;  %1319 = vmatpush.bf16.msra.mxu3 %v1296_v3  ;;  %v1287_v3 = vld [vmem:[#allocation3 + $0x58] sm:$0xff] }
  0x1c   :  { %478 = vmatpush.bf16.msra.mxu1 %v1305_v18 }
  0x1f   :  { %275 = vmatpush.bf16.msra.mxu0 %v1295_v4  ;;  %1320 = vmatpush.bf16.msra.mxu3 %v1295_v4 }
  0x20   :  { %479 = vmatpush.bf16.msra.mxu1 %v1304_v19 }
  0x23   :  { %276 = vmatpush.bf16.msra.mxu0 %v1294_v5  ;;  %1321 = vmatpush.bf16.msra.mxu3 %v1294_v5 }
  0x24   :  { %480 = vmatpush.bf16.msra.mxu1 %v1303_v20 }
  0x27   :  { %277 = vmatpush.bf16.msra.mxu0 %v1293_v6  ;;  %1322 = vmatpush.bf16.msra.mxu3 %v1293_v6 }
  0x28   :  { %481 = vmatpush.bf16.msra.mxu1 %v1302_v23 }
  0x2b   :  { %278 = vmatpush.bf16.msra.mxu0 %v1292_v7  ;;  %1323 = vmatpush.bf16.msra.mxu3 %v1292_v7 }
  0x2c   :  { %482 = vmatpush.bf16.msra.mxu1 %v1301_v24 }
  0x2e   :  { %279 = vmatmul.bf16.vlgmr.msra.gmra.mxu0 %v1276_v8  ;;  %339 = vmatmul.bf16.vlgmr.msra.gmra.mxu3 %v1288_v9 }
  0x2f   :  { %1324 = vmatpush.bf16.msrb.mxu3 %v1307_v15 }
  0x30   :  { %483 = vmatpush.bf16.msra.mxu1 %v1300_v25 }
  0x33   :  { %1325 = vmatpush.bf16.msrb.mxu3 %v1306_v17 }
  0x37   :  { %1326 = vmatpush.bf16.msrb.mxu3 %v1305_v18 }
  0x3b   :  { %1327 = vmatpush.bf16.msrb.mxu3 %v1304_v19 }
  0x3e   :  { %284 = vmatmul.bf16.gmra.mxu0 %v1277_v10  ;;  %344 = vmatmul.bf16.gmra.mxu3 %v1289_v11 }
  0x3f   :  { %1328 = vmatpush.bf16.msrb.mxu3 %v1303_v20 }
  0x43   :  { %1329 = vmatpush.bf16.msrb.mxu3 %v1302_v23 }
  0x47   :  { %1330 = vmatpush.bf16.msrb.mxu3 %v1301_v24 }
  0x4b   :  { %1331 = vmatpush.bf16.msrb.mxu3 %v1300_v25 }
  0x4e   :  { %289 = vmatmul.bf16.gmra.mxu0 %v1278_v12  ;;  %349 = vmatmul.bf16.gmra.mxu3 %v1290_v22  ;;  %v1315_v22 = vld [vmem:[#allocation8 + $0x78] sm:$0xff] }
  0x4f   :  { %683 = vmatpush.bf16.msra.mxu2 %v1315_v22  ;;  %1332 = vmatpush.bf16.msra.mxu3 %v1315_v22 }
  0x5e   :  { %294 = vmatmul.bf16.gmra.mxu0 %v1279_v13  ;;  %354 = vmatmul.bf16.gmra.mxu3 %v1291_v27 }
  0x6e   :  { %299 = vmatmul.bf16.gmra.mxu0 %v1280_v14 }
  0x7e   :  { %304 = vmatmul.bf16.gmra.mxu0 %v1281_v16 }
  0x8e   :  { %309 = vmatmul.bf16.gmra.mxu0 %v1282_v21 }
  0x9e   :  { %314 = vmatmul.bf16.gmra.mxu0 %v1283_v26  ;;  %v1314_v26 = vld [vmem:[#allocation8 + $0x70] sm:$0xff] }
  0x9f   :  { %684 = vmatpush.bf16.msra.mxu2 %v1314_v26  ;;  %1333 = vmatpush.bf16.msra.mxu3 %v1314_v26 }
  0xab   :  { %v280_v29 = vpop.f32.mrf.mxu0 }
  0xac   :  { %v281_v32 = vadd.f32 %v1512_v30, %v280_v29 }
  0xae   :  { %319 = vmatmul.bf16.gmra.mxu0 %v1284_v28  ;;  %v360_v35 = vmax.f32 %v281_v32, 0.0  ;;  %v1313_v28 = vld [vmem:[#allocation8 + $0x68] sm:$0xff] }
  0xaf   :  { %685 = vmatpush.bf16.msra.mxu2 %v1313_v28  ;;  %1334 = vmatpush.bf16.msra.mxu3 %v1313_v28 }
  0xb1   :  { %v340_v31 = vpop.f32.mrf.mxu3 }
  0xb2   :  { %v341_v37 = vadd.f32 %v1512_v30, %v340_v31  ;;  %v1312_v31 = vld [vmem:[#allocation8 + $0x60] sm:$0xff] }
  0xb3   :  { %v282_v33 = vpop.f32.mrf.mxu0  ;;  %686 = vmatpush.bf16.msra.mxu2 %v1312_v31  ;;  %1335 = vmatpush.bf16.msra.mxu3 %v1312_v31 }
  0xb4   :  { %v283_v34 = vadd.f32 %v1512_v30, %v282_v33  ;;  %v384_v40 = vmax.f32 %v341_v37, 0.0 }
  0xb6   :  { %v361_v36 = vmax.f32 %v283_v34, 0.0 }
  0xb8   :  { %v408_v38 = vpack.c.bf16 %v361_v36, %v360_v35  ;;  %v1311_v36 = vld [vmem:[#allocation8 + $0x58] sm:$0xff] }
  0xb9   :  { %v342_v39 = vpop.f32.mrf.mxu3  ;;  %687 = vmatpush.bf16.msra.mxu2 %v1311_v36  ;;  %1336 = vmatpush.bf16.msra.mxu3 %v1311_v36 }
  0xba   :  { %484 = vmatmul.bf16.vlgmr.msra.gmra.mxu1 %v408_v38  ;;  %v343_v42 = vadd.f32 %v1512_v30, %v342_v39 }
  0xbb   :  { %v285_v43 = vpop.f32.mrf.mxu0 }
  0xbc   :  { %v385_v44 = vmax.f32 %v343_v42, 0.0  ;;  %v286_v47 = vadd.f32 %v1512_v30, %v285_v43  ;;  %v1310_v43 = vld [vmem:[#allocation8 + $0x50] sm:$0xff] }
  0xbd   :  { %688 = vmatpush.bf16.msra.mxu2 %v1310_v43  ;;  %1337 = vmatpush.bf16.msra.mxu3 %v1310_v43 }
  0xbe   :  { %324 = vmatmul.bf16.gmra.mxu0 %v1285_v41  ;;  %v420_v45 = vpack.c.bf16 %v385_v44, %v384_v40  ;;  %v362_v50 = vmax.f32 %v286_v47, 0.0  ;;  %v1309_v47 = vld [vmem:[#allocation8 + $0x48] sm:$0xff] }
  0xc0   :  { %544 = vmatmul.bf16.vlgmr.msrb.gmra.mxu3 %v420_v45 }
  0xc1   :  { %v345_v46 = vpop.f32.mrf.mxu3  ;;  %689 = vmatpush.bf16.msra.mxu2 %v1309_v47  ;;  %1338 = vmatpush.bf16.msra.mxu3 %v1309_v47 }
  0xc2   :  { %v346_v52 = vadd.f32 %v1512_v30, %v345_v46 }
  0xc3   :  { %v287_v48 = vpop.f32.mrf.mxu0 }
  0xc4   :  { %v288_v49 = vadd.f32 %v1512_v30, %v287_v48  ;;  %v386_v55 = vmax.f32 %v346_v52, 0.0 }
  0xc6   :  { %v363_v51 = vmax.f32 %v288_v49, 0.0  ;;  %v1308_v49 = vld [vmem:[#allocation8 + $0x40] sm:$0xff] }
  0xc7   :  { %690 = vmatpush.bf16.msra.mxu2 %v1308_v49  ;;  %1339 = vmatpush.bf16.msra.mxu3 %v1308_v49 }
  0xc8   :  { %v409_v53 = vpack.c.bf16 %v363_v51, %v362_v50 }
  0xc9   :  { %v347_v54 = vpop.f32.mrf.mxu3 }
  0xca   :  { %489 = vmatmul.bf16.gmra.mxu1 %v409_v53  ;;  %v348_v57 = vadd.f32 %v1512_v30, %v347_v54 }
  0xcb   :  { %v290_v58 = vpop.f32.mrf.mxu0 }
  0xcc   :  { %v387_v59 = vmax.f32 %v348_v57, 0.0  ;;  %v291_v61 = vadd.f32 %v1512_v30, %v290_v58 }
  0xce   :  { %329 = vmatmul.bf16.gmra.mxu0 %v1286_v56  ;;  %v421_v60 = vpack.c.bf16 %v387_v59, %v386_v55  ;;  %v364_v0 = vmax.f32 %v291_v61, 0.0 }
  0xd0   :  { %549 = vmatmul.bf16.gmra.mxu3 %v421_v60 }
  0xd1   :  { %v350_v29 = vpop.f32.mrf.mxu3 }
  0xd2   :  { %v351_v35 = vadd.f32 %v1512_v30, %v350_v29 }
  0xd3   :  { %v292_v62 = vpop.f32.mrf.mxu0 }
  0xd4   :  { %v293_v63 = vadd.f32 %v1512_v30, %v292_v62  ;;  %v388_v41 = vmax.f32 %v351_v35, 0.0 }
  0xd6   :  { %v365_v1 = vmax.f32 %v293_v63, 0.0 }
  0xd8   :  { %v410_v2 = vpack.c.bf16 %v365_v1, %v364_v0 }
  0xd9   :  { %v352_v39 = vpop.f32.mrf.mxu3 }
  0xda   :  { %494 = vmatmul.bf16.gmra.mxu1 %v410_v2  ;;  %v353_v42 = vadd.f32 %v1512_v30, %v352_v39 }
  0xdb   :  { %v295_v4 = vpop.f32.mrf.mxu0 }
  0xdc   :  { %v296_v5 = vadd.f32 %v1512_v30, %v295_v4  ;;  %v389_v44 = vmax.f32 %v353_v42, 0.0 }
  0xde   :  { %334 = vmatmul.bf16.gmra.mxu0 %v1287_v3  ;;  %v366_v8 = vmax.f32 %v296_v5, 0.0  ;;  %v422_v46 = vpack.c.bf16 %v389_v44, %v388_v41 }
  0xe0   :  { %554 = vmatmul.bf16.gmra.mxu3 %v422_v46 }
  0xe1   :  { %v355_v48 = vpop.f32.mrf.mxu3 }
  0xe2   :  { %v356_v53 = vadd.f32 %v1512_v30, %v355_v48 }
  0xe3   :  { %v297_v6 = vpop.f32.mrf.mxu0 }
  0xe4   :  { %v298_v7 = vadd.f32 %v1512_v30, %v297_v6  ;;  %v390_v58 = vmax.f32 %v356_v53, 0.0  ;;  %v1543_v6 = vld [vmem:[%s1792_s4] ss:$0 sm:$0xff] }
  0xe6   :  { %v367_v9 = vmax.f32 %v298_v7, 0.0 }
  0xe8   :  { %v411_v10 = vpack.c.bf16 %v367_v9, %v366_v8 }
  0xe9   :  { %v357_v56 = vpop.f32.mrf.mxu3 }
  0xea   :  { %499 = vmatmul.bf16.gmra.mxu1 %v411_v10  ;;  %v358_v59 = vadd.f32 %v1512_v30, %v357_v56 }
  0xeb   :  { %v300_v11 = vpop.f32.mrf.mxu0 }
  0xec   :  { %v301_v12 = vadd.f32 %v1512_v30, %v300_v11  ;;  %v391_v60 = vmax.f32 %v358_v59, 0.0 }
  0xee   :  { %v368_v15 = vmax.f32 %v301_v12, 0.0  ;;  %v423_v62 = vpack.c.bf16 %v391_v60, %v390_v58 }
  0xf0   :  { %559 = vmatmul.bf16.gmra.mxu3 %v423_v62 }
  0xf3   :  { %v302_v13 = vpop.f32.mrf.mxu0 }
  0xf4   :  { %v303_v14 = vadd.f32 %v1512_v30, %v302_v13 }
  0xf6   :  { %v369_v16 = vmax.f32 %v303_v14, 0.0 }
  0xf8   :  { %v412_v17 = vpack.c.bf16 %v369_v16, %v368_v15 }
  0xfa   :  { %504 = vmatmul.bf16.gmra.mxu1 %v412_v17 }
  0xfb   :  { %v305_v18 = vpop.f32.mrf.mxu0 }
  0xfc   :  { %v306_v19 = vadd.f32 %v1512_v30, %v305_v18 }
  0xfe   :  { %v370_v23 = vmax.f32 %v306_v19, 0.0 }
 0x103   :  { %v307_v20 = vpop.f32.mrf.mxu0 }
 0x104   :  { %v308_v21 = vadd.f32 %v1512_v30, %v307_v20 }
 0x106   :  { %v371_v24 = vmax.f32 %v308_v21, 0.0 }
 0x108   :  { %v413_v25 = vpack.c.bf16 %v371_v24, %v370_v23 }
 0x10a   :  { %509 = vmatmul.bf16.gmra.mxu1 %v413_v25 }
 0x10b   :  { %v310_v27 = vpop.f32.mrf.mxu0 }
 0x10c   :  { %v311_v32 = vadd.f32 %v1512_v30, %v310_v27 }
 0x10e   :  { %v372_v37 = vmax.f32 %v311_v32, 0.0 }
 0x113   :  { %v312_v33 = vpop.f32.mrf.mxu0 }
 0x114   :  { %v313_v34 = vadd.f32 %v1512_v30, %v312_v33 }
 0x116   :  { %v373_v38 = vmax.f32 %v313_v34, 0.0 }
 0x118   :  { %v414_v40 = vpack.c.bf16 %v373_v38, %v372_v37 }
 0x11a   :  { %514 = vmatmul.bf16.gmra.mxu1 %v414_v40 }
 0x11b   :  { %v315_v45 = vpop.f32.mrf.mxu0 }
 0x11c   :  { %v316_v50 = vadd.f32 %v1512_v30, %v315_v45 }
 0x11e   :  { %v374_v54 = vmax.f32 %v316_v50, 0.0 }
 0x123   :  { %v317_v51 = vpop.f32.mrf.mxu0 }
 0x124   :  { %v318_v52 = vadd.f32 %v1512_v30, %v317_v51 }
 0x126   :  { %v375_v55 = vmax.f32 %v318_v52, 0.0 }
 0x128   :  { %v415_v57 = vpack.c.bf16 %v375_v55, %v374_v54 }
 0x12a   :  { %519 = vmatmul.bf16.gmra.mxu1 %v415_v57 }
 0x12b   :  { %v320_v61 = vpop.f32.mrf.mxu0 }
 0x12c   :  { %v321_v63 = vadd.f32 %v1512_v30, %v320_v61 }
 0x12e   :  { %v376_v2 = vmax.f32 %v321_v63, 0.0 }
 0x133   :  { %v322_v0 = vpop.f32.mrf.mxu0 }
 0x134   :  { %v323_v1 = vadd.f32 %v1512_v30, %v322_v0 }
 0x136   :  { %v377_v3 = vmax.f32 %v323_v1, 0.0 }
 0x137   :  { %v485_v4 = vpop.f32.mrf.mxu1 }
 0x138   :  { %v416_v5 = vpack.c.bf16 %v377_v3, %v376_v2  ;;  %v486_v8 = vadd.f32 %v1543_v6, %v485_v4 }
 0x13a   :  { %524 = vmatmul.bf16.gmra.mxu1 %v416_v5  ;;  %v565_v11 = vmax.f32 %v486_v8, 0.0 }
 0x13b   :  { %v325_v7 = vpop.f32.mrf.mxu0 }
 0x13c   :  { %v326_v12 = vadd.f32 %v1512_v30, %v325_v7 }
 0x13e   :  { %v378_v18 = vmax.f32 %v326_v12, 0.0 }
 0x13f   :  { %v487_v9 = vpop.f32.mrf.mxu1 }
 0x140   :  { %v488_v10 = vadd.f32 %v1543_v6, %v487_v9 }
 0x142   :  { %v566_v13 = vmax.f32 %v488_v10, 0.0 }
 0x143   :  { %v327_v14 = vpop.f32.mrf.mxu0  ;;  %v545_v15 = vpop.f32.mrf.mxu3 }
 0x144   :  { %v328_v16 = vadd.f32 %v1512_v30, %v327_v14  ;;  %v614_v17 = vpack.c.bf16 %v566_v13, %v565_v11  ;;  %v546_v22 = vadd.f32 %v1543_v6, %v545_v15 }
 0x146   :  { %v379_v19 = vmax.f32 %v328_v16, 0.0  ;;  %691 = vmatmul.bf16.vlgmr.msra.gmra.mxu2 %v614_v17  ;;  %v589_v25 = vmax.f32 %v546_v22, 0.0 }
 0x147   :  { %v490_v20 = vpop.f32.mrf.mxu1 }
 0x148   :  { %v417_v21 = vpack.c.bf16 %v379_v19, %v378_v18  ;;  %v491_v27 = vadd.f32 %v1543_v6, %v490_v20 }
 0x14a   :  { %529 = vmatmul.bf16.gmra.mxu1 %v417_v21  ;;  %v567_v33 = vmax.f32 %v491_v27, 0.0 }
 0x14b   :  { %v330_v23 = vpop.f32.mrf.mxu0  ;;  %v547_v24 = vpop.f32.mrf.mxu3 }
 0x14c   :  { %v548_v26 = vadd.f32 %v1543_v6, %v547_v24  ;;  %v331_v34 = vadd.f32 %v1512_v30, %v330_v23 }
 0x14e   :  { %v590_v28 = vmax.f32 %v548_v26, 0.0  ;;  %v380_v40 = vmax.f32 %v331_v34, 0.0 }
 0x14f   :  { %v492_v29 = vpop.f32.mrf.mxu1 }
 0x150   :  { %v493_v31 = vadd.f32 %v1543_v6, %v492_v29  ;;  %v626_v32 = vpack.c.bf16 %v590_v28, %v589_v25 }
 0x152   :  { %v568_v35 = vmax.f32 %v493_v31, 0.0  ;;  %751 = vmatmul.bf16.vlgmr.msra.gmra.mxu3 %v626_v32 }
 0x153   :  { %v332_v36 = vpop.f32.mrf.mxu0  ;;  %v550_v37 = vpop.f32.mrf.mxu3 }
 0x154   :  { %v333_v38 = vadd.f32 %v1512_v30, %v332_v36  ;;  %v615_v39 = vpack.c.bf16 %v568_v35, %v567_v33  ;;  %v551_v44 = vadd.f32 %v1543_v6, %v550_v37 }
 0x156   :  { %v381_v41 = vmax.f32 %v333_v38, 0.0  ;;  %696 = vmatmul.bf16.gmra.mxu2 %v615_v39  ;;  %v591_v47 = vmax.f32 %v551_v44, 0.0 }
 0x157   :  { %v495_v42 = vpop.f32.mrf.mxu1 }
 0x158   :  { %v418_v43 = vpack.c.bf16 %v381_v41, %v380_v40  ;;  %v496_v49 = vadd.f32 %v1543_v6, %v495_v42 }
 0x15a   :  { %534 = vmatmul.bf16.gmra.mxu1 %v418_v43  ;;  %v569_v54 = vmax.f32 %v496_v49, 0.0 }
 0x15b   :  { %v335_v45 = vpop.f32.mrf.mxu0  ;;  %v552_v46 = vpop.f32.mrf.mxu3 }
 0x15c   :  { %v553_v48 = vadd.f32 %v1543_v6, %v552_v46  ;;  %v336_v55 = vadd.f32 %v1512_v30, %v335_v45 }
 0x15e   :  { %v592_v50 = vmax.f32 %v553_v48, 0.0  ;;  %v382_v60 = vmax.f32 %v336_v55, 0.0 }
 0x15f   :  { %v497_v51 = vpop.f32.mrf.mxu1 }
 0x160   :  { %v498_v52 = vadd.f32 %v1543_v6, %v497_v51  ;;  %v627_v53 = vpack.c.bf16 %v592_v50, %v591_v47 }
 0x162   :  { %v570_v56 = vmax.f32 %v498_v52, 0.0  ;;  %756 = vmatmul.bf16.gmra.mxu3 %v627_v53  ;;  %v1580_v53 = vld [vmem:[%s1792_s4 + $0x1] ss:$0 sm:$0xff] }
 0x163   :  { %v337_v57 = vpop.f32.mrf.mxu0  ;;  %v555_v27 = vpop.f32.mrf.mxu3 }
 0x164   :  { %v338_v58 = vadd.f32 %v1512_v30, %v337_v57  ;;  %v616_v59 = vpack.c.bf16 %v570_v56, %v569_v54  ;;  %v556_v37 = vadd.f32 %v1543_v6, %v555_v27 }
 0x166   :  { %v383_v61 = vmax.f32 %v338_v58, 0.0  ;;  %701 = vmatmul.bf16.gmra.mxu2 %v616_v59  ;;  %v593_v40 = vmax.f32 %v556_v37, 0.0  ;;  %v1586_v59 = vld [vmem:[%s1793_s5] ss:$0 sm:$0xff] }
 0x167   :  { %v500_v62 = vpop.f32.mrf.mxu1 }
 0x168   :  { %v419_v63 = vpack.c.bf16 %v383_v61, %v382_v60  ;;  %v501_v0 = vadd.f32 %v1543_v6, %v500_v62 }
 0x16a   :  { %539 = vmatmul.bf16.gmra.mxu1 %v419_v63  ;;  %v571_v3 = vmax.f32 %v501_v0, 0.0 }
 0x16b   :  { %v557_v32 = vpop.f32.mrf.mxu3 }
 0x16c   :  { %v558_v38 = vadd.f32 %v1543_v6, %v557_v32 }
 0x16e   :  { %v594_v41 = vmax.f32 %v558_v38, 0.0 }
 0x16f   :  { %v502_v1 = vpop.f32.mrf.mxu1 }
 0x170   :  { %v503_v2 = vadd.f32 %v1543_v6, %v502_v1  ;;  %v628_v43 = vpack.c.bf16 %v594_v41, %v593_v40 }
 0x172   :  { %v572_v4 = vmax.f32 %v503_v2, 0.0  ;;  %761 = vmatmul.bf16.gmra.mxu3 %v628_v43 }
 0x173   :  { %v560_v42 = vpop.f32.mrf.mxu3 }
 0x174   :  { %v617_v5 = vpack.c.bf16 %v572_v4, %v571_v3  ;;  %v561_v51 = vadd.f32 %v1543_v6, %v560_v42 }
 0x176   :  { %706 = vmatmul.bf16.gmra.mxu2 %v617_v5  ;;  %v595_v55 = vmax.f32 %v561_v51, 0.0 }
 0x177   :  { %v505_v7 = vpop.f32.mrf.mxu1 }
 0x178   :  { %v506_v8 = vadd.f32 %v1543_v6, %v505_v7 }
 0x17a   :  { %v573_v10 = vmax.f32 %v506_v8, 0.0 }
 0x17b   :  { %v562_v49 = vpop.f32.mrf.mxu3 }
 0x17c   :  { %v563_v52 = vadd.f32 %v1543_v6, %v562_v49 }
 0x17e   :  { %v596_v56 = vmax.f32 %v563_v52, 0.0 }
 0x17f   :  { %v507_v30 = vpop.f32.mrf.mxu1 }
 0x180   :  { %v508_v9 = vadd.f32 %v1543_v6, %v507_v30  ;;  %v629_v61 = vpack.c.bf16 %v596_v56, %v595_v55 }
 0x182   :  { %v574_v11 = vmax.f32 %v508_v9, 0.0  ;;  %766 = vmatmul.bf16.gmra.mxu3 %v629_v61 }
 0x184   :  { %v618_v12 = vpack.c.bf16 %v574_v11, %v573_v10 }
 0x186   :  { %711 = vmatmul.bf16.gmra.mxu2 %v618_v12 }
 0x187   :  { %v510_v13 = vpop.f32.mrf.mxu1 }
 0x188   :  { %v511_v14 = vadd.f32 %v1543_v6, %v510_v13 }
 0x18a   :  { %v575_v17 = vmax.f32 %v511_v14, 0.0 }
 0x18f   :  { %v512_v15 = vpop.f32.mrf.mxu1 }
 0x190   :  { %v513_v16 = vadd.f32 %v1543_v6, %v512_v15 }
 0x192   :  { %v576_v18 = vmax.f32 %v513_v16, 0.0 }
 0x194   :  { %v619_v19 = vpack.c.bf16 %v576_v18, %v575_v17 }
 0x196   :  { %716 = vmatmul.bf16.gmra.mxu2 %v619_v19 }
 0x197   :  { %v515_v20 = vpop.f32.mrf.mxu1 }
 0x198   :  { %v516_v21 = vadd.f32 %v1543_v6, %v515_v20 }
 0x19a   :  { %v577_v24 = vmax.f32 %v516_v21, 0.0 }
 0x19f   :  { %v517_v22 = vpop.f32.mrf.mxu1 }
 0x1a0   :  { %v518_v23 = vadd.f32 %v1543_v6, %v517_v22 }
 0x1a2   :  { %v578_v25 = vmax.f32 %v518_v23, 0.0 }
 0x1a4   :  { %v620_v26 = vpack.c.bf16 %v578_v25, %v577_v24 }
 0x1a6   :  { %721 = vmatmul.bf16.gmra.mxu2 %v620_v26 }
 0x1a7   :  { %v520_v28 = vpop.f32.mrf.mxu1 }
 0x1a8   :  { %v521_v29 = vadd.f32 %v1543_v6, %v520_v28 }
 0x1aa   :  { %v579_v34 = vmax.f32 %v521_v29, 0.0 }
 0x1af   :  { %v522_v31 = vpop.f32.mrf.mxu1 }
 0x1b0   :  { %v523_v33 = vadd.f32 %v1543_v6, %v522_v31 }
 0x1b2   :  { %v580_v35 = vmax.f32 %v523_v33, 0.0 }
 0x1b4   :  { %v621_v36 = vpack.c.bf16 %v580_v35, %v579_v34 }
 0x1b6   :  { %726 = vmatmul.bf16.gmra.mxu2 %v621_v36 }
 0x1b7   :  { %v525_v39 = vpop.f32.mrf.mxu1 }
 0x1b8   :  { %v526_v44 = vadd.f32 %v1543_v6, %v525_v39 }
 0x1ba   :  { %v581_v47 = vmax.f32 %v526_v44, 0.0 }
 0x1bf   :  { %v527_v45 = vpop.f32.mrf.mxu1 }
 0x1c0   :  { %v528_v46 = vadd.f32 %v1543_v6, %v527_v45 }
 0x1c2   :  { %v582_v48 = vmax.f32 %v528_v46, 0.0 }
 0x1c4   :  { %v622_v50 = vpack.c.bf16 %v582_v48, %v581_v47 }
 0x1c6   :  { %731 = vmatmul.bf16.gmra.mxu2 %v622_v50 }
 0x1c7   :  { %v530_v54 = vpop.f32.mrf.mxu1 }
 0x1c8   :  { %v531_v62 = vadd.f32 %v1543_v6, %v530_v54 }
 0x1c9   :  { %v692_v57 = vpop.f32.mrf.mxu2 }
 0x1ca   :  { %v693_v58 = vadd.f32 %v1580_v53, %v692_v57  ;;  %v583_v3 = vmax.f32 %v531_v62, 0.0 }
 0x1cc   :  { %v772_v60 = vmax.f32 %v693_v58, 0.0 }
 0x1ce   :  { %v808_v63 = vmul.f32 %v1586_v59, %v772_v60 }
 0x1cf   :  { %v532_v0 = vpop.f32.mrf.mxu1 }
 0x1d0   :  { %v533_v1 = vadd.f32 %v1543_v6, %v532_v0  ;;  %840 = vadd.xlane.f32.xlu0 %v808_v63 }
 0x1d1   :  { %v694_v2 = vpop.f32.mrf.mxu2 }
 0x1d2   :  { %v584_v4 = vmax.f32 %v533_v1, 0.0  ;;  %v695_v5 = vadd.f32 %v1580_v53, %v694_v2 }
 0x1d4   :  { %v773_v7 = vmax.f32 %v695_v5, 0.0  ;;  %v623_v8 = vpack.c.bf16 %v584_v4, %v583_v3 }
 0x1d5   :  { %v752_v30 = vpop.f32.mrf.mxu3 }
 0x1d6   :  { %736 = vmatmul.bf16.gmra.mxu2 %v623_v8  ;;  %v809_v9 = vmul.f32 %v1586_v59, %v773_v7  ;;  %v753_v10 = vadd.f32 %v1580_v53, %v752_v30 }
 0x1d7   :  { %v535_v11 = vpop.f32.mrf.mxu1 }
 0x1d8   :  { %842 = vadd.xlane.f32.xlu0 %v809_v9  ;;  %v796_v12 = vmax.f32 %v753_v10, 0.0  ;;  %v536_v18 = vadd.f32 %v1543_v6, %v535_v11 }
 0x1d9   :  { %v697_v13 = vpop.f32.mrf.mxu2 }
 0x1da   :  { %v698_v14 = vadd.f32 %v1580_v53, %v697_v13  ;;  %v832_v15 = vmul.f32 %v1586_v59, %v796_v12  ;;  %v585_v25 = vmax.f32 %v536_v18, 0.0 }
 0x1dc   :  { %v774_v16 = vmax.f32 %v698_v14, 0.0  ;;  %888 = vadd.xlane.f32.xlu2 %v832_v15 }
 0x1dd   :  { %v754_v17 = vpop.f32.mrf.mxu3 }
 0x1de   :  { %v810_v19 = vmul.f32 %v1586_v59, %v774_v16  ;;  %v755_v20 = vadd.f32 %v1580_v53, %v754_v17 }
 0x1df   :  { %v537_v21 = vpop.f32.mrf.mxu1 }
 0x1e0   :  { %v538_v22 = vadd.f32 %v1543_v6, %v537_v21  ;;  %844 = vadd.xlane.f32.xlu1 %v810_v19  ;;  %v797_v23 = vmax.f32 %v755_v20, 0.0 }
 0x1e1   :  { %v699_v24 = vpop.f32.mrf.mxu2 }
 0x1e2   :  { %v586_v26 = vmax.f32 %v538_v22, 0.0  ;;  %v700_v27 = vadd.f32 %v1580_v53, %v699_v24  ;;  %v833_v31 = vmul.f32 %v1586_v59, %v797_v23 }
 0x1e4   :  { %v775_v28 = vmax.f32 %v700_v27, 0.0  ;;  %v624_v29 = vpack.c.bf16 %v586_v26, %v585_v25 }
 0x1e5   :  { %v757_v32 = vpop.f32.mrf.mxu3 }
 0x1e6   :  { %741 = vmatmul.bf16.gmra.mxu2 %v624_v29  ;;  %v811_v33 = vmul.f32 %v1586_v59, %v775_v28  ;;  %v758_v34 = vadd.f32 %v1580_v53, %v757_v32 }
 0x1e7   :  { %v540_v35 = vpop.f32.mrf.mxu1 }
 0x1e8   :  { %846 = vadd.xlane.f32.xlu0 %v811_v33  ;;  %890 = vadd.xlane.f32.xlu1 %v833_v31  ;;  %v798_v36 = vmax.f32 %v758_v34, 0.0  ;;  %v541_v41 = vadd.f32 %v1543_v6, %v540_v35 }
 0x1e9   :  { %v702_v37 = vpop.f32.mrf.mxu2 }
 0x1ea   :  { %v703_v38 = vadd.f32 %v1580_v53, %v702_v37  ;;  %v834_v40 = vmul.f32 %v1586_v59, %v798_v36  ;;  %v587_v46 = vmax.f32 %v541_v41, 0.0 }
 0x1ec   :  { %v776_v39 = vmax.f32 %v703_v38, 0.0 }
 0x1ed   :  { %v759_v33 = vpop.f32.mrf.mxu3 }
 0x1ee   :  { %v812_v42 = vmul.f32 %v1586_v59, %v776_v39 }
 0x1ef   :  { %v542_v43 = vpop.f32.mrf.mxu1 }
 0x1f0   :  { %v543_v44 = vadd.f32 %v1543_v6, %v542_v43  ;;  %848 = vadd.xlane.f32.xlu2 %v812_v42  ;;  %892 = vadd.xlane.f32.xlu0 %v834_v40 }
 0x1f1   :  { %v704_v45 = vpop.f32.mrf.mxu2 }
 0x1f2   :  { %v588_v47 = vmax.f32 %v543_v44, 0.0  ;;  %v705_v48 = vadd.f32 %v1580_v53, %v704_v45  ;;  %v760_v45 = vadd.f32 %v1580_v53, %v759_v33  ;;  %v938_v33 = vlaneseq }
 0x1f4   :  { %v777_v49 = vmax.f32 %v705_v48, 0.0  ;;  %v625_v50 = vpack.c.bf16 %v588_v47, %v587_v46 }
 0x1f5   :  { %v762_v38 = vpop.f32.mrf.mxu3 }
 0x1f6   :  { %746 = vmatmul.bf16.gmra.mxu2 %v625_v50  ;;  %v813_v51 = vmul.f32 %v1586_v59, %v777_v49  ;;  %v799_v50 = vmax.f32 %v760_v45, 0.0 }
 0x1f8   :  { %850 = vadd.xlane.f32.xlu1 %v813_v51 }
 0x1f9   :  { %v707_v52 = vpop.f32.mrf.mxu2 }
 0x1fa   :  { %v708_v54 = vadd.f32 %v1580_v53, %v707_v52 }
 0x1fc   :  { %v778_v55 = vmax.f32 %v708_v54, 0.0 }
 0x1fd   :  { %v764_v48 = vpop.f32.mrf.mxu3 }
 0x1fe   :  { %v814_v56 = vmul.f32 %v1586_v59, %v778_v55  ;;  %v763_v55 = vadd.f32 %v1580_v53, %v762_v38 }
 0x200   :  { %852 = vadd.xlane.f32.xlu0 %v814_v56  ;;  %v835_v56 = vmul.f32 %v1586_v59, %v799_v50  ;;  %v1458_v50 = vmov 0.0  }
 0x201   :  { %v709_v6 = vpop.f32.mrf.mxu2 }
 0x202   :  { %v710_v57 = vadd.f32 %v1580_v53, %v709_v6 }
 0x204   :  { %v779_v58 = vmax.f32 %v710_v57, 0.0 }
 0x206   :  { %v815_v60 = vmul.f32 %v1586_v59, %v779_v58  ;;  %v767_v58 = vpop.f32.mrf.mxu3 }
 0x208   :  { %854 = vadd.xlane.f32.xlu2 %v815_v60 }
 0x209   :  { %v712_v61 = vpop.f32.mrf.mxu2 }
 0x20a   :  { %v713_v62 = vadd.f32 %v1580_v53, %v712_v61  ;;  %v800_v61 = vmax.f32 %v763_v55, 0.0 }
 0x20c   :  { %v780_v63 = vmax.f32 %v713_v62, 0.0 }
 0x20e   :  { %v816_v0 = vmul.f32 %v1586_v59, %v780_v63 }
 0x210   :  { %856 = vadd.xlane.f32.xlu1 %v816_v0 }
 0x211   :  { %v714_v1 = vpop.f32.mrf.mxu2 }
 0x212   :  { %v715_v2 = vadd.f32 %v1580_v53, %v714_v1 }
 0x214   :  { %v781_v3 = vmax.f32 %v715_v2, 0.0  ;;  %v768_v2 = vadd.f32 %v1580_v53, %v767_v58 }
 0x216   :  { %v817_v4 = vmul.f32 %v1586_v59, %v781_v3  ;;  %v836_v3 = vmul.f32 %v1586_v59, %v800_v61 }
 0x218   :  { %858 = vadd.xlane.f32.xlu0 %v817_v4 }
 0x219   :  { %v717_v5 = vpop.f32.mrf.mxu2 }
 0x21a   :  { %v718_v7 = vadd.f32 %v1580_v53, %v717_v5  ;;  %v765_v5 = vadd.f32 %v1580_v53, %v764_v48 }
 0x21c   :  { %v782_v8 = vmax.f32 %v718_v7, 0.0 }
 0x21e   :  { %v818_v30 = vmul.f32 %v1586_v59, %v782_v8  ;;  %v802_v8 = vmax.f32 %v768_v2, 0.0 }
 0x220   :  { %860 = vadd.xlane.f32.xlu2 %v818_v30  ;;  %v801_v30 = vmax.f32 %v765_v5, 0.0 }
 0x221   :  { %v719_v9 = vpop.f32.mrf.mxu2 }
 0x222   :  { %v720_v10 = vadd.f32 %v1580_v53, %v719_v9  ;;  %v769_v9 = vpop.f32.mrf.mxu3 }
 0x224   :  { %v783_v11 = vmax.f32 %v720_v10, 0.0  ;;  %v770_v10 = vadd.f32 %v1580_v53, %v769_v9 }
 0x226   :  { %v819_v12 = vmul.f32 %v1586_v59, %v783_v11  ;;  %v838_v11 = vmul.f32 %v1586_v59, %v802_v8 }
 0x228   :  { %862 = vadd.xlane.f32.xlu1 %v819_v12 }
 0x229   :  { %v722_v13 = vpop.f32.mrf.mxu2 }
 0x22a   :  { %v723_v39 = vadd.f32 %v1580_v53, %v722_v13 }
 0x22c   :  { %v784_v42 = vmax.f32 %v723_v39, 0.0  ;;  %v1681_v39 = vand.u32 127, %v938_v33 }
 0x22e   :  { %v820_v47 = vmul.f32 %v1586_v59, %v784_v42 }
 0x231   :  { %v724_v14 = vpop.f32.mrf.mxu2 }
 0x232   :  { %v725_v54 = vadd.f32 %v1580_v53, %v724_v14  ;;  %v837_v14 = vmul.f32 %v1586_v59, %v801_v30 }
 0x234   :  { %v785_v57 = vmax.f32 %v725_v54, 0.0 }
 0x236   :  { %v821_v0 = vmul.f32 %v1586_v59, %v785_v57 }
 0x239   :  { %v727_v15 = vpop.f32.mrf.mxu2 }
 0x23a   :  { %v728_v1 = vadd.f32 %v1580_v53, %v727_v15  ;;  %v803_v15 = vmax.f32 %v770_v10, 0.0 }
 0x23c   :  { %v786_v7 = vmax.f32 %v728_v1, 0.0 }
 0x23e   :  { %v822_v12 = vmul.f32 %v1586_v59, %v786_v7 }
 0x241   :  { %v1623_v16 = vpop.f32.mrf.mxu2 }
 0x242   :  { %v730_v13 = vadd.f32 %v1580_v53, %v1623_v16 }
 0x249   :  { %v732_v17 = vpop.f32.mrf.mxu2 }
 0x24a   :  { %v733_v18 = vadd.f32 %v1580_v53, %v732_v17  ;;  %v787_v17 = vmax.f32 %v730_v13, 0.0 }
 0x24c   :  { %v788_v19 = vmax.f32 %v733_v18, 0.0  ;;  %v839_v18 = vmul.f32 %v1586_v59, %v803_v15 }
 0x24e   :  { %v824_v20 = vmul.f32 %v1586_v59, %v788_v19  ;;  %v823_v19 = vmul.f32 %v1586_v59, %v787_v17 }
 0x250   :  { %872 = vadd.xlane.f32.xlu1 %v824_v20  ;;  %v841_v20 = vpop.xlane.xlu0 %840 }
 0x251   :  { %v734_v21 = vpop.f32.mrf.mxu2 }
 0x252   :  { %v735_v22 = vadd.f32 %v1580_v53, %v734_v21  ;;  %v1660_v21 = vpop.xlane.xlu2 %888 }
 0x254   :  { %v789_v23 = vmax.f32 %v735_v22, 0.0  ;;  %v845_v22 = vpop.xlane.xlu1 %844 }
 0x256   :  { %v825_v24 = vmul.f32 %v1586_v59, %v789_v23 }
 0x258   :  { %874 = vadd.xlane.f32.xlu2 %v825_v24  ;;  %v843_v23 = vpop.xlane.xlu0 %842 }
 0x259   :  { %v737_v25 = vpop.f32.mrf.mxu2 }
 0x25a   :  { %v738_v26 = vadd.f32 %v1580_v53, %v737_v25 }
 0x25c   :  { %v790_v27 = vmax.f32 %v738_v26, 0.0 }
 0x25e   :  { %v826_v28 = vmul.f32 %v1586_v59, %v790_v27 }
 0x260   :  { %876 = vadd.xlane.f32.xlu2 %v826_v28  ;;  %v847_v16 = vpop.xlane.xlu0 %846 }
 0x261   :  { %v739_v29 = vpop.f32.mrf.mxu2 }
 0x262   :  { %v740_v31 = vadd.f32 %v1580_v53, %v739_v29 }
 0x263   :  { %v849_v24 = vpop.xlane.xlu2 %848 }
 0x264   :  { %v791_v32 = vmax.f32 %v740_v31, 0.0 }
 0x266   :  { %v827_v34 = vmul.f32 %v1586_v59, %v791_v32 }
 0x268   :  { %878 = vadd.xlane.f32.xlu1 %v827_v34  ;;  %v1666_v27 = vpop.xlane.xlu0 %892 }
 0x269   :  { %v742_v35 = vpop.f32.mrf.mxu2 }
 0x26a   :  { %v743_v36 = vadd.f32 %v1580_v53, %v742_v35  ;;  %v1678_v35 = vshrl.u32 %v938_v33, 7 }
 0x26c   :  { %v792_v37 = vmax.f32 %v743_v36, 0.0  ;;  %v940_v38 = vadd.s32 8, %v1678_v35  ;;  %v947_v42 = vadd.s32 64, %v1678_v35  ;;  %vm957_vm1 = vcmp.eq.s32.totalorder %v1678_v35, %v1681_v39 }
 0x26d   :  { %v1260_v55 = vsel %vm957_vm1, 1.0, %v1458_v50  ;;  %v945_v1 = vadd.s32 48, %v1678_v35  ;;  %v946_v9 = vadd.s32 56, %v1678_v35 }
 0x26e   :  { %v828_v40 = vmul.f32 %v1586_v59, %v792_v37  ;;  %vm958_vm0 = vcmp.eq.s32.totalorder %v940_v38, %v1681_v39  ;;  %vm965_vm4 = vcmp.eq.s32.totalorder %v947_v42, %v1681_v39 }
 0x26f   :  { %vm963_vm7 = vcmp.eq.s32.totalorder %v945_v1, %v1681_v39  ;;  %vm964_vm8 = vcmp.eq.s32.totalorder %v946_v9, %v1681_v39 }
 0x270   :  { %880 = vadd.xlane.f32.xlu0 %v828_v40  ;;  %v941_v40 = vadd.s32 16, %v1678_v35 }
 0x271   :  { %v744_v41 = vpop.f32.mrf.mxu2 }
 0x272   :  { %v745_v43 = vadd.f32 %v1580_v53, %v744_v41  ;;  %v942_v41 = vadd.s32 24, %v1678_v35  ;;  %vm959_vm2 = vcmp.eq.s32.totalorder %v941_v40, %v1681_v39 }
 0x273   :  { %v1672_v31 = vpop.xlane.xlu0 %852 }
 0x274   :  { %v793_v44 = vmax.f32 %v745_v43, 0.0  ;;  %v943_v43 = vadd.s32 32, %v1678_v35  ;;  %vm960_vm3 = vcmp.eq.s32.totalorder %v942_v41, %v1681_v39 }
 0x275   :  { %v1263_v57 = vsel %vm960_vm3, 1.0, %v1458_v50 }
 0x276   :  { %v829_v46 = vmul.f32 %v1586_v59, %v793_v44  ;;  %v1691_v44 = vstv %s1794_s6  ;;  %vm961_vm5 = vcmp.eq.s32.totalorder %v943_v43, %v1681_v39  ;;  %v1267_v43 = vsel %vm964_vm8, 1.0, %v1458_v50  ;;  %s1459_s6 = smov [#allocation9]  }
 0x277   :  { %v910_v8 = vadd.f32 %v1691_v44, %v849_v24  ;;  %v930_v17 = vadd.f32 %v1691_v44, %v1660_v21  ;;  %v1266_v21 = vsel %vm963_vm7, 1.0, %v1458_v50  ;;  %s1086_s22 = sshll.u32 %s1459_s6, 4  ;;  %s1087_s22 = int_to_ptr.vmem [resolvable:$true] %s1086_s22 }
 0x278   :  { %882 = vadd.xlane.f32.xlu2 %v829_v46  ;;  %864 = vadd.xlane.f32.xlu0 %v820_v47  ;;  %v907_v46 = vadd.f32 %v1691_v44, %v843_v23  ;;  %v944_v47 = vadd.s32 40, %v1678_v35 }
 0x279   :  { %v747_v49 = vpop.f32.mrf.mxu2 }
 0x27a   :  { %v748_v51 = vadd.f32 %v1580_v53, %v747_v49  ;;  %vm962_vm6 = vcmp.eq.s32.totalorder %v944_v47, %v1681_v39 }
 0x27b   :  { %v1664_v25 = vpop.xlane.xlu2 %854  ;;  %v1265_v30 = vsel %vm962_vm6, 1.0, %v1458_v50 }
 0x27c   :  { %v794_v52 = vmax.f32 %v748_v51, 0.0  ;;  %v1261_v51 = vsel %vm958_vm0, 1.0, %v1458_v50  ;;  %v913_v42 = vadd.f32 %v1691_v44, %v1664_v25 }
 0x27d   :  { %v1006_v58 = vmul.f32 %v1261_v51, %v907_v46 }
 0x27e   :  { %v830_v6 = vmul.f32 %v1586_v59, %v794_v52  ;;  %v906_v52 = vadd.f32 %v1691_v44, %v841_v20 }
 0x280   :  { %894 = vadd.xlane.f32.xlu2 %v835_v56  ;;  %884 = vadd.xlane.f32.xlu1 %v830_v6  ;;  %v1262_v56 = vsel %vm959_vm2, 1.0, %v1458_v50  ;;  %v908_v6 = vadd.f32 %v1691_v44, %v845_v22  ;;  %v1005_v2 = vmul.f32 %v1260_v55, %v906_v52  ;;  %v949_v22 = vadd.s32 80, %v1678_v35 }
 0x281   :  { %v749_v60 = vpop.f32.mrf.mxu2 }
 0x282   :  { %v750_v62 = vadd.f32 %v1580_v53, %v749_v60  ;;  %v1662_v53 = vpop.xlane.xlu1 %890  ;;  %v1007_v7 = vmul.f32 %v1262_v56, %v908_v6  ;;  %v1021_v10 = vadd.f32 %v1006_v58, %v1005_v2  ;;  %vm967_vm10 = vcmp.eq.s32.totalorder %v949_v22, %v1681_v39 }
 0x283   :  { %v1012_v6 = vmul.f32 %v1267_v43, %v913_v42  ;;  %v951_v58 = vadd.s32 96, %v1678_v35 }
 0x284   :  { %v795_v63 = vmax.f32 %v750_v62, 0.0  ;;  %v1712_v62 = vsel %vm965_vm4, 1.0, %v1458_v50 }
 0x285   :  { %vm969_vm12 = vcmp.eq.s32.totalorder %v951_v58, %v1681_v39 }
 0x286   :  { %v831_v4 = vmul.f32 %v1586_v59, %v795_v63  ;;  %v909_v63 = vadd.f32 %v1691_v44, %v847_v16 }
 0x288   :  { %866 = vadd.xlane.f32.xlu2 %v821_v0  ;;  %896 = vadd.xlane.f32.xlu1 %v836_v3  ;;  %v1264_v0 = vsel %vm961_vm5, 1.0, %v1458_v50  ;;  %v948_v3 = vadd.s32 72, %v1678_v35 }
 0x289   :  { %886 = vadd.xlane.f32.xlu0 %v831_v4  ;;  %v1009_v33 = vmul.f32 %v1264_v0, %v910_v8 }
 0x28a   :  { %v851_v26 = vpop.xlane.xlu1 %850  ;;  %vm966_vm9 = vcmp.eq.s32.totalorder %v948_v3, %v1681_v39 }
 0x28b   :  { %v1676_v34 = vpop.xlane.xlu0 %858  ;;  %v1269_v52 = vsel %vm966_vm9, 1.0, %v1458_v50 }
 0x290   :  { %900 = vadd.xlane.f32.xlu2 %v838_v11  ;;  %868 = vadd.xlane.f32.xlu1 %v822_v12 }
 0x291   :  { %898 = vadd.xlane.f32.xlu0 %v837_v14 }
 0x292   :  { %v1670_v29 = vpop.xlane.xlu1 %856 }
 0x293   :  { %v1668_v28 = vpop.xlane.xlu2 %860 }
 0x298   :  { %902 = vadd.xlane.f32.xlu1 %v839_v18  ;;  %v1008_v18 = vmul.f32 %v1263_v57, %v909_v63  ;;  %v1270_v63 = vsel %vm967_vm10, 1.0, %v1458_v50 }
 0x299   :  { %870 = vadd.xlane.f32.xlu0 %v823_v19  ;;  %v911_v19 = vadd.f32 %v1691_v44, %v851_v26 }
 0x29b   :  { %v1674_v32 = vpop.xlane.xlu1 %862  ;;  %v1010_v41 = vmul.f32 %v1265_v30, %v911_v19 }
 0x29c   :  { %v917_v9 = vadd.f32 %v1691_v44, %v1674_v32 }
 0x2c3   :  { %v873_v36 = vpop.xlane.xlu1 %872 }
 0x2c4   :  { %v922_v60 = vadd.f32 %v1691_v44, %v873_v36  ;;  %v912_v36 = vadd.f32 %v1691_v44, %v1672_v31 }
 0x2c6   :  { %v1043_v11 = vmul.f32 %v1260_v55, %v922_v60  ;;  %v1011_v47 = vmul.f32 %v1266_v21, %v912_v36 }
 0x2cb   :  { %v875_v59 = vpop.xlane.xlu2 %874 }
 0x2cc   :  { %v923_v54 = vadd.f32 %v1691_v44, %v875_v59  ;;  %v1022_v59 = vadd.f32 %v1021_v10, %v1007_v7 }
 0x2ce   :  { %v1044_v4 = vmul.f32 %v1261_v51, %v923_v54  ;;  %v1023_v40 = vadd.f32 %v1022_v59, %v1008_v18  ;;  %v1051_v51 = vmul.f32 %v1712_v62, %v930_v17  ;;  %v1272_v17 = vsel %vm969_vm12, 1.0, %v1458_v50 }
 0x2d0   :  { %v1059_v23 = vadd.f32 %v1044_v4, %v1043_v11  ;;  %v1024_v46 = vadd.f32 %v1023_v40, %v1009_v33  ;;  %v932_v4 = vadd.f32 %v1691_v44, %v1666_v27  ;;  %v953_v11 = vadd.s32 112, %v1678_v35 }
 0x2d2   :  { %v1053_v22 = vmul.f32 %v1270_v63, %v932_v4  ;;  %vm971_vm14 = vcmp.eq.s32.totalorder %v953_v11, %v1681_v39 }
 0x2d3   :  { %v877_v37 = vpop.xlane.xlu2 %876  ;;  %v1274_v42 = vsel %vm971_vm14, 1.0, %v1458_v50 }
 0x2d4   :  { %v924_v61 = vadd.f32 %v1691_v44, %v877_v37 }
 0x2d6   :  { %v1045_v12 = vmul.f32 %v1262_v56, %v924_v61  ;;  %v1025_v56 = vadd.f32 %v1024_v46, %v1010_v41 }
 0x2d8   :  { %v1060_v37 = vadd.f32 %v1059_v23, %v1045_v12  ;;  %v1026_v2 = vadd.f32 %v1025_v56, %v1011_v47 }
 0x2da   :  { %v1027_v8 = vadd.f32 %v1026_v2, %v1012_v6 }
 0x2db   :  { %v879_v48 = vpop.xlane.xlu1 %878 }
 0x2dc   :  { %v925_v5 = vadd.f32 %v1691_v44, %v879_v48  ;;  %v914_v48 = vadd.f32 %v1691_v44, %v1670_v29  ;;  %v931_v29 = vadd.f32 %v1691_v44, %v1662_v53  ;;  %v952_v53 = vadd.s32 104, %v1678_v35 }
 0x2de   :  { %v1046_v24 = vmul.f32 %v1263_v57, %v925_v5  ;;  %v915_v57 = vadd.f32 %v1691_v44, %v1676_v34  ;;  %v1013_v3 = vmul.f32 %v1712_v62, %v914_v48  ;;  %v916_v34 = vadd.f32 %v1691_v44, %v1668_v28 }
 0x2df   :  { %v1052_v62 = vmul.f32 %v1269_v52, %v931_v29  ;;  %vm970_vm13 = vcmp.eq.s32.totalorder %v952_v53, %v1681_v39 }
 0x2e0   :  { %v1061_v31 = vadd.f32 %v1060_v37, %v1046_v24  ;;  %v1028_v12 = vadd.f32 %v1027_v8, %v1013_v3 }
 0x2e3   :  { %v881_v45 = vpop.xlane.xlu0 %880 }
 0x2e4   :  { %v926_v13 = vadd.f32 %v1691_v44, %v881_v45 }
 0x2e6   :  { %v1047_v26 = vmul.f32 %v1264_v0, %v926_v13  ;;  %v1015_v13 = vmul.f32 %v1270_v63, %v916_v34 }
 0x2e8   :  { %v1062_v54 = vadd.f32 %v1061_v31, %v1047_v26 }
 0x2eb   :  { %v883_v49 = vpop.xlane.xlu2 %882  ;;  %v865_v20 = vpop.xlane.xlu0 %864 }
 0x2ec   :  { %v927_v16 = vadd.f32 %v1691_v44, %v883_v49  ;;  %v950_v49 = vadd.s32 88, %v1678_v35  ;;  %v918_v27 = vadd.f32 %v1691_v44, %v865_v20 }
 0x2ee   :  { %v1048_v45 = vmul.f32 %v1265_v30, %v927_v16  ;;  %vm968_vm11 = vcmp.eq.s32.totalorder %v950_v49, %v1681_v39  ;;  %v1014_v30 = vmul.f32 %v1269_v52, %v915_v57  ;;  %v1017_v36 = vmul.f32 %v1272_v17, %v918_v27 }
 0x2ef   :  { %v1271_v10 = vsel %vm968_vm11, 1.0, %v1458_v50 }
 0x2f0   :  { %v1063_v0 = vadd.f32 %v1062_v54, %v1048_v45  ;;  %v1029_v23 = vadd.f32 %v1028_v12, %v1014_v30  ;;  %v1016_v24 = vmul.f32 %v1271_v10, %v917_v9 }
 0x2f3   :  { %v1723_v14 = vpop.xlane.xlu2 %894  ;;  %v885_v15 = vpop.xlane.xlu1 %884 }
 0x2f4   :  { %v928_v38 = vadd.f32 %v1691_v44, %v885_v15  ;;  %v954_v15 = vadd.s32 120, %v1678_v35  ;;  %v933_v18 = vadd.f32 %v1691_v44, %v1723_v14  ;;  %v1030_v35 = vadd.f32 %v1029_v23, %v1015_v13 }
 0x2f6   :  { %v1049_v55 = vmul.f32 %v1266_v21, %v928_v38  ;;  %v1273_v21 = vsel %vm970_vm13, 1.0, %v1458_v50  ;;  %vm972_vm15 = vcmp.eq.s32.totalorder %v954_v15, %v1681_v39  ;;  %v1054_v37 = vmul.f32 %v1271_v10, %v933_v18 }
 0x2f7   :  { %v1031_v41 = vadd.f32 %v1030_v35, %v1016_v24  ;;  %v1275_v47 = vsel %vm972_vm15, 1.0, %v1458_v50 }
 0x2f8   :  { %v1064_v5 = vadd.f32 %v1063_v0, %v1049_v55 }
 0x2f9   :  { %v1032_v48 = vadd.f32 %v1031_v41, %v1017_v36 }
 0x2fb   :  { %v897_v25 = vpop.xlane.xlu1 %896  ;;  %v867_v60 = vpop.xlane.xlu2 %866 }
 0x2fc   :  { %v887_v61 = vpop.xlane.xlu0 %886  ;;  %v919_v59 = vadd.f32 %v1691_v44, %v867_v60  ;;  %v934_v33 = vadd.f32 %v1691_v44, %v897_v25 }
 0x2fd   :  { %v929_v1 = vadd.f32 %v1691_v44, %v887_v61 }
 0x2fe   :  { %v1055_v31 = vmul.f32 %v1272_v17, %v934_v33 }
 0x2ff   :  { %v1050_v7 = vmul.f32 %v1267_v43, %v929_v1  ;;  %v1018_v43 = vmul.f32 %v1273_v21, %v919_v59 }
 0x301   :  { %v1065_v28 = vadd.f32 %v1064_v5, %v1050_v7  ;;  %v1033_v25 = vadd.f32 %v1032_v48, %v1018_v43 }
 0x303   :  { %v1066_v32 = vadd.f32 %v1065_v28, %v1051_v51  ;;  %v869_v19 = vpop.xlane.xlu1 %868  ;;  %v901_v14 = vpop.xlane.xlu2 %900 }
 0x304   :  { %v899_v16 = vpop.xlane.xlu0 %898  ;;  %v920_v26 = vadd.f32 %v1691_v44, %v869_v19  ;;  %v936_v45 = vadd.f32 %v1691_v44, %v901_v14 }
 0x305   :  { %v1067_v20 = vadd.f32 %v1066_v32, %v1052_v62  ;;  %v935_v40 = vadd.f32 %v1691_v44, %v899_v16 }
 0x306   :  { %v1019_v49 = vmul.f32 %v1274_v42, %v920_v26  ;;  %v1057_v56 = vmul.f32 %v1274_v42, %v936_v45 }
 0x307   :  { %v1068_v38 = vadd.f32 %v1067_v20, %v1053_v22  ;;  %v1056_v39 = vmul.f32 %v1273_v21, %v935_v40 }
 0x308   :  { %v1034_v60 = vadd.f32 %v1033_v25, %v1019_v49 }
 0x309   :  { %v1069_v46 = vadd.f32 %v1068_v38, %v1054_v37 }
 0x30b   :  { %v1070_v51 = vadd.f32 %v1069_v46, %v1055_v31  ;;  %v903_v52 = vpop.xlane.xlu1 %902 }
 0x30c   :  { %v937_v54 = vadd.f32 %v1691_v44, %v903_v52  ;;  %v871_v55 = vpop.xlane.xlu0 %870 }
 0x30d   :  { %v1071_v6 = vadd.f32 %v1070_v51, %v1056_v39  ;;  %v921_v57 = vadd.f32 %v1691_v44, %v871_v55 }
 0x30e   :  { %v1058_v58 = vmul.f32 %v1275_v47, %v937_v54 }
 0x30f   :  { %v1072_v61 = vadd.f32 %v1071_v6, %v1057_v56  ;;  %v1020_v29 = vmul.f32 %v1275_v47, %v921_v57 }
 0x311   :  { %v1073_v63 = vadd.f32 %v1072_v61, %v1058_v58  ;;  %v1035_v0 = vadd.f32 %v1034_v60, %v1020_v29 }
 0x313   :  { %v1074_v50 = vrot.slane %v1073_v63, 4  ;;  %v1036_v1 = vrot.slane %v1035_v0, 4 }
 0x315   :  { %v1075_v2 = vadd.f32 %v1074_v50, %v1073_v63  ;;  %v1037_v3 = vadd.f32 %v1036_v1, %v1035_v0 }
 0x317   :  { %v1076_v34 = vrot.slane %v1075_v2, 2  ;;  %v1038_v4 = vrot.slane %v1037_v3, 2 }
 0x319   :  { %v1077_v5 = vadd.f32 %v1076_v34, %v1075_v2  ;;  %v1039_v53 = vadd.f32 %v1038_v4, %v1037_v3 }
 0x31b   :  { %v1040_v7 = vrot.slane %v1039_v53, 1  ;;  %v1078_v8 = vrot.slane %v1077_v5, 1 }
 0x31d   :  { %v1041_v44 = vadd.f32 %v1040_v7, %v1039_v53  ;;  %v1079_v30 = vadd.f32 %v1078_v8, %v1077_v5 }
 0x31f   :  { %1042 = vst [vmem:[#allocation9] sm:$0x1] %v1041_v44 }
 0x320   :  { %1080 = vst [vmem:[#allocation9 + $0x1] sm:$0x1] %v1079_v30 }
 0x321   :  { %1091 = dma.vmem_to_hbm [thread:$0]  %s1087_s22, 32, %s1089_s25, [#allocation5]  }
 0x322   :  { %1451 = dma.done.wait [#allocation5], 32  }
 0x323   :  { %1452 = vsyncadd [#allocation5], 4294967264 }
 0x324   :  { %1096 = vsyncpa [#allocation4], 1 }
 0x325   :  { %1097 = vsyncpa [#allocation7], 1 }
 0x326   :  { %1098 = vsyncpa [#allocation5], 1 }

</bundles_post_ra>
